<compile_context>
chip_gen: v6e
topology: v6e:2x2x1
jax: 0.10.0
libtpu: 0.0.40
codegen_flags: <defaults>
</compile_context>

<pallas_src>
import math
import functools

import numpy as np
import jax
import jax.numpy as jnp
from jax.experimental import pallas as pl
from jax.experimental.pallas import tpu as pltpu


def encoder_layer_kernel(x_ref,
                         wq_ref, bq_ref, wkv_ref, bkv_ref,
                         wo_ref, bo_ref,
                         w1_ref, b1_ref, w2_ref, b2_ref,
                         g1_ref, be1_ref, g2_ref, be2_ref,
                         out_ref,
                         kv_scr, q_scr, attn_scr,
                         *, nhead, tq, eps=1e-5):
    cdt = wq_ref.dtype                       # compute dtype for MXU operands (f32/bf16)
    S, D = x_ref.shape[1], x_ref.shape[2]
    hd = D // nhead
    scale = 1.0 / math.sqrt(hd)
    qi = pl.program_id(1)
    bf16_math = (wq_ref.dtype == jnp.bfloat16)

    def mm(a, b):
        # a @ b with f32 accumulation; left operand cast to the compute dtype.
        return jnp.dot(a.astype(cdt), b, preferred_element_type=jnp.float32)

    # --- K/V in-projection hoisted: computed once per batch element (qi == 0) into a
    #     persistent VMEM scratch; later query blocks just read it. -------------------
    @pl.when(qi == 0)
    def _():
        kv = mm(x_ref[0], wkv_ref[...]) + bkv_ref[...]         # [S, 2D] f32
        kv_scr[...] = kv.astype(kv_scr.dtype)

    # Query rows of this tile, sliced from the resident full-sequence block
    # (no separate double-buffered query input / DMA).
    row0 = pl.multiple_of(qi * tq, tq)
    xq = x_ref[0, pl.ds(row0, tq), :]                          # [TQ, D] f32

    # Q projection with the softmax scale folded in; staged in VMEM so the per-head
    # reads below are static ref slices (bounds live ranges, no relayout copies).
    q_scr[...] = ((mm(xq, wq_ref[...]) + bq_ref[...]) * scale).astype(q_scr.dtype)

    # --- per-head attention; heads written to VMEM scratch at static column offsets --
    for h in range(nhead):
        sl = slice(h * hd, (h + 1) * hd)
        qh = q_scr[:, sl]                                      # [TQ, hd]  cdt
        kh = kv_scr[:, sl]                                     # [S,  hd]  cdt
        vh = kv_scr[:, D + h * hd:D + (h + 1) * hd]            # [S,  hd]  cdt
        # q @ k^T without an in-kernel transpose: contract the last axes of both.
        s = jax.lax.dot_general(qh, kh, (((1,), (1,)), ((), ())),
                                preferred_element_type=jnp.float32)   # [TQ, S]
        s = s - jnp.max(s, axis=-1, keepdims=True)
        # exp in bf16 on the bf16 path (v6e/v7x EUP); reductions stay f32.
        p = jnp.exp(s.astype(cdt)) if bf16_math else jnp.exp(s)
        denom = jnp.sum(p.astype(jnp.float32), axis=-1, keepdims=True)      # [TQ, 1]
        o_h = jnp.dot(p.astype(cdt), vh, preferred_element_type=jnp.float32)
        # Normalize after PV (TQ x hd elements instead of TQ x S); reciprocal -> EUP.
        attn_scr[:, sl] = o_h * pl.reciprocal(denom, approx=False)

    attn = mm(attn_scr[...], wo_ref[...]) + bo_ref[...]        # [TQ, D] f32

    # --- residual + LayerNorm1 (f32) --------------------------------------------------
    h1 = xq + attn
    mu1 = jnp.mean(h1, axis=-1, keepdims=True)
    var1 = jnp.mean((h1 - mu1) ** 2, axis=-1, keepdims=True)
    h1n = (h1 - mu1) * jax.lax.rsqrt(var1 + eps) * g1_ref[...] + be1_ref[...]

    # --- feed-forward: Linear -> ReLU -> Linear ---------------------------------------
    ff = jnp.maximum(mm(h1n, w1_ref[...]) + b1_ref[...], 0.0)
    ff = mm(ff, w2_ref[...]) + b2_ref[...]

    # --- residual + LayerNorm2 (f32) --------------------------------------------------
    h2 = h1n + ff
    mu2 = jnp.mean(h2, axis=-1, keepdims=True)
    var2 = jnp.mean((h2 - mu2) ** 2, axis=-1, keepdims=True)
    out = (h2 - mu2) * jax.lax.rsqrt(var2 + eps) * g2_ref[...] + be2_ref[...]

    out_ref[0] = out.astype(out_ref.dtype)


def transformer_encoder_layer(src, params, nhead, *,
                              compute_dtype=jnp.float32, tq=None):
    """src: [seq_len, batch, d_model] (PyTorch convention). Returns same shape (f32)."""
    S, B, D = src.shape
    F = params["w1"].shape[0]
    assert D % nhead == 0, "d_model must be divisible by nhead"

    cdt = np.dtype(compute_dtype)
    # Activations stay f32 (residual adds / LayerNorm see f32); matmul operands are
    # cast to the compute dtype inside the kernel.
    x = jnp.transpose(src, (1, 0, 2)).astype(jnp.float32)      # [B, S, D]

    # --- one-time host-side weight prep: transpose, fuse K|V, cast matmul operands ---
    wq_t = params["in_proj_w"][:D].T.astype(cdt)               # [D, D]
    wkv_t = params["in_proj_w"][D:].T.astype(cdt)              # [D, 2D]  (K | V fused)
    bq = params["in_proj_b"][:D].reshape(1, D).astype(jnp.float32)
    bkv = params["in_proj_b"][D:].reshape(1, 2 * D).astype(jnp.float32)
    wo_t = params["wo"].T.astype(cdt)                          # [D, D]
    bo = params["bo"].reshape(1, D).astype(jnp.float32)
    w1_t = params["w1"].T.astype(cdt)                          # [D, F]
    b1 = params["b1"].reshape(1, F).astype(jnp.float32)
    w2_t = params["w2"].T.astype(cdt)                          # [F, D]
    b2 = params["b2"].reshape(1, D).astype(jnp.float32)
    g1 = params["g1"].reshape(1, D).astype(jnp.float32)
    be1 = params["be1"].reshape(1, D).astype(jnp.float32)
    g2 = params["g2"].reshape(1, D).astype(jnp.float32)
    be2 = params["be2"].reshape(1, D).astype(jnp.float32)

    # Query-block tile size (bounds the [TQ, S] score working set at large S).
    if tq is None:
        tq = 128 if (S > 128 and S % 128 == 0) else S
    assert S % tq == 0, f"tq={tq} must divide seq_len={S}"
    nqb = S // tq

    # Rough VMEM requirement -> generation-safe limit (<= 56 MiB so the request also
    # fits v7x's 64 MiB physical VMEM with headroom; v5e/v6e have 128 MiB).
    wbytes = cdt.itemsize * (4 * D * D + 2 * D * F)
    need = (wbytes + 4 * (9 * D + F)                         # weights + biases/LN
            + 2 * 4 * S * D + 2 * 4 * tq * D                 # x / out blocks (2-buf)
            + cdt.itemsize * (2 * S * D + tq * D) + 4 * tq * D   # scratches
            + 4 * (tq * S + tq * F + 6 * tq * D + 2 * S * D))    # temporaries
    vmem_limit = int(min(56 * 2 ** 20, max(24 * 2 ** 20, 2 * need)))

    cost = pl.CostEstimate(
        flops=int(B * (8 * S * D * D + 4 * S * S * D + 4 * S * D * F)),
        transcendentals=int(B * nhead * S * S),
        bytes_accessed=int(2 * B * S * D * 4 + wbytes),
    )

    kernel = functools.partial(encoder_layer_kernel, nhead=nhead, tq=tq)

    def call(single_buffer_weights):
        def inv(shape):
            # Grid-invariant block (weights / biases / LN params). Single-buffered when
            # supported: the block never changes, so double-buffering only doubles its
            # VMEM residency.
            if single_buffer_weights:
                return pl.BlockSpec(shape, lambda b, qi: (0, 0),
                                    pipeline_mode=pl.Buffered(1))
            return pl.BlockSpec(shape, lambda b, qi: (0, 0))

        in_specs = [
            pl.BlockSpec((1, S, D), lambda b, qi: (b, 0, 0)),   # full sequence (Q/K/V src)
            inv((D, D)), inv((1, D)),                           # wq_t, bq
            inv((D, 2 * D)), inv((1, 2 * D)),                   # wkv_t, bkv
            inv((D, D)), inv((1, D)),                           # wo_t, bo
            inv((D, F)), inv((1, F)),                           # w1_t, b1
            inv((F, D)), inv((1, D)),                           # w2_t, b2
            inv((1, D)), inv((1, D)),                           # ln1 gamma, beta
            inv((1, D)), inv((1, D)),                           # ln2 gamma, beta
        ]
        return pl.pallas_call(
            kernel,
            out_shape=jax.ShapeDtypeStruct((B, S, D), jnp.float32),
            grid=(B, nqb),
            in_specs=in_specs,
            out_specs=pl.BlockSpec((1, tq, D), lambda b, qi: (b, qi, 0)),
            scratch_shapes=[
                pltpu.VMEM((S, 2 * D), cdt),        # persistent K|V (per batch element)
                pltpu.VMEM((tq, D), cdt),           # scaled Q for this query block
                pltpu.VMEM((tq, D), jnp.float32),   # per-head output stitch
            ],
            compiler_params=pltpu.CompilerParams(
                # qi carries the K/V-scratch dependence -> "arbitrary";
                # batch stays "parallel" for megacore / v7x 2-TC sharding.
                dimension_semantics=("parallel", "arbitrary"),
                vmem_limit_bytes=vmem_limit,
            ),
            cost_estimate=cost,
        )(x, wq_t, bq, wkv_t, bkv, wo_t, bo,
          w1_t, b1, w2_t, b2, g1, be1, g2, be2)

    try:
        out = jax.block_until_ready(call(True))
    except Exception:
        # pipeline_mode=pl.Buffered(1) not accepted by this jax/Mosaic build:
        # fall back to default double-buffering (correctness unaffected).
        out = jax.block_until_ready(call(False))

    return jnp.transpose(out, (1, 0, 2))  # back to [S, B, D]


# ----------------------------- pure-JAX reference -----------------------------

def _layernorm_ref(x, g, b, eps=1e-5):
    mu = jnp.mean(x, axis=-1, keepdims=True)
    var = jnp.mean((x - mu) ** 2, axis=-1, keepdims=True)
    return (x - mu) * jax.lax.rsqrt(var + eps) * g + b


def reference(src, p, nhead):
    S, B, D = src.shape
    hd = D // nhead
    x = jnp.transpose(src, (1, 0, 2))  # [B, S, D]
    wq, wk, wv = p["in_proj_w"][:D], p["in_proj_w"][D:2 * D], p["in_proj_w"][2 * D:]
    bq, bk, bv = p["in_proj_b"][:D], p["in_proj_b"][D:2 * D], p["in_proj_b"][2 * D:]
    q = (x @ wq.T + bq).reshape(B, S, nhead, hd)
    k = (x @ wk.T + bk).reshape(B, S, nhead, hd)
    v = (x @ wv.T + bv).reshape(B, S, nhead, hd)
    scores = jnp.einsum("bqhd,bkhd->bhqk", q, k) / math.sqrt(hd)
    pr = jax.nn.softmax(scores, axis=-1)
    attn = jnp.einsum("bhqk,bkhd->bqhd", pr, v).reshape(B, S, D)
    attn = attn @ p["wo"].T + p["bo"]
    h1 = _layernorm_ref(x + attn, p["g1"], p["be1"])
    ff = jnp.maximum(h1 @ p["w1"].T + p["b1"], 0.0) @ p["w2"].T + p["b2"]
    h2 = _layernorm_ref(h1 + ff, p["g2"], p["be2"])
    return jnp.transpose(h2, (1, 0, 2))


def init_params(key, d_model, nhead, dim_feedforward):
    ks = jax.random.split(key, 8)
    D, F = d_model, dim_feedforward
    s = 0.1
    return {
        "in_proj_w": jax.random.normal(ks[0], (3 * D, D), jnp.float32) * s,
        "in_proj_b": jax.random.normal(ks[1], (3 * D,), jnp.float32) * s,
        "wo": jax.random.normal(ks[2], (D, D), jnp.float32) * s,
        "bo": jax.random.normal(ks[3], (D,), jnp.float32) * s,
        "w1": jax.random.normal(ks[4], (F, D), jnp.float32) * s,
        "b1": jax.random.normal(ks[5], (F,), jnp.float32) * s,
        "w2": jax.random.normal(ks[6], (D, F), jnp.float32) * s,
        "b2": jax.random.normal(ks[7], (D,), jnp.float32) * s,
        "g1": jnp.ones((D,), jnp.float32), "be1": jnp.zeros((D,), jnp.float32),
        "g2": jnp.ones((D,), jnp.float32), "be2": jnp.zeros((D,), jnp.float32),
    }


if __name__ == "__main__":
    d_model, nhead, dim_feedforward = 32, 4, 64
    seq_len, batch = 8, 2

    key = jax.random.PRNGKey(0)
    k_src, k_par = jax.random.split(key)
    src = jax.random.normal(k_src, (seq_len, batch, d_model), jnp.float32)
    params = init_params(k_par, d_model, nhead, dim_feedforward)

    ref = reference(src, params, nhead)

    # f32 compute path — tight check against the pure-JAX reference.
    out = transformer_encoder_layer(src, params, nhead)
    out = jax.block_until_ready(out)
    assert out.shape == (seq_len, batch, d_model)
    err = jnp.max(jnp.abs(out - ref))
    assert jnp.allclose(out, ref, atol=1e-4, rtol=1e-4), f"f32 max err {err}"

    # bf16 matmul path (f32 accumulation; residuals/LayerNorm in f32) — looser check.
    out_bf16 = transformer_encoder_layer(src, params, nhead,
                                         compute_dtype=jnp.bfloat16)
    out_bf16 = jax.block_until_ready(out_bf16)
    err_bf16 = jnp.max(jnp.abs(out_bf16 - ref))
    assert jnp.allclose(out_bf16, ref, atol=5e-2, rtol=5e-2), \
        f"bf16 max err {err_bf16}"

    print("KERNEL_OK")
</pallas_src>

<mosaic_0001>
module attributes {stable_mosaic.version = 11 : i64} {
  func.func @encoder_layer_kernel(%arg0: i32, %arg1: i32, %arg2: memref<1x8x32xf32, #tpu.memory_space<vmem>>, %arg3: memref<32x32xf32, #tpu.memory_space<vmem>>, %arg4: memref<1x32xf32, #tpu.memory_space<vmem>>, %arg5: memref<32x64xf32, #tpu.memory_space<vmem>>, %arg6: memref<1x64xf32, #tpu.memory_space<vmem>>, %arg7: memref<32x32xf32, #tpu.memory_space<vmem>>, %arg8: memref<1x32xf32, #tpu.memory_space<vmem>>, %arg9: memref<32x64xf32, #tpu.memory_space<vmem>>, %arg10: memref<1x64xf32, #tpu.memory_space<vmem>>, %arg11: memref<64x32xf32, #tpu.memory_space<vmem>>, %arg12: memref<1x32xf32, #tpu.memory_space<vmem>>, %arg13: memref<1x32xf32, #tpu.memory_space<vmem>>, %arg14: memref<1x32xf32, #tpu.memory_space<vmem>>, %arg15: memref<1x32xf32, #tpu.memory_space<vmem>>, %arg16: memref<1x32xf32, #tpu.memory_space<vmem>>, %arg17: memref<1x8x32xf32, #tpu.memory_space<vmem>>, %arg18: memref<8x64xf32, #tpu.memory_space<vmem>>, %arg19: memref<8x32xf32, #tpu.memory_space<vmem>>, %arg20: memref<8x32xf32, #tpu.memory_space<vmem>>) attributes {dimension_semantics = [#tpu.dimension_semantics<parallel>, #tpu.dimension_semantics<arbitrary>], iteration_bounds = array<i64: 2, 1>, scalar_prefetch = 0 : i64, scratch_operands = 3 : i64, tpu.core_type = #tpu.core_type<tc>, window_params = [{transform_indices = @transform_0, window_bounds = array<i64: 1, 8, 32>}, {pipeline_mode = #tpu.pipeline_mode<synchronous>, transform_indices = @transform_1, window_bounds = array<i64: 32, 32>}, {pipeline_mode = #tpu.pipeline_mode<synchronous>, transform_indices = @transform_2, window_bounds = array<i64: 1, 32>}, {pipeline_mode = #tpu.pipeline_mode<synchronous>, transform_indices = @transform_3, window_bounds = array<i64: 32, 64>}, {pipeline_mode = #tpu.pipeline_mode<synchronous>, transform_indices = @transform_4, window_bounds = array<i64: 1, 64>}, {pipeline_mode = #tpu.pipeline_mode<synchronous>, transform_indices = @transform_5, window_bounds = array<i64: 32, 32>}, {pipeline_mode = #tpu.pipeline_mode<synchronous>, transform_indices = @transform_6, window_bounds = array<i64: 1, 32>}, {pipeline_mode = #tpu.pipeline_mode<synchronous>, transform_indices = @transform_7, window_bounds = array<i64: 32, 64>}, {pipeline_mode = #tpu.pipeline_mode<synchronous>, transform_indices = @transform_8, window_bounds = array<i64: 1, 64>}, {pipeline_mode = #tpu.pipeline_mode<synchronous>, transform_indices = @transform_9, window_bounds = array<i64: 64, 32>}, {pipeline_mode = #tpu.pipeline_mode<synchronous>, transform_indices = @transform_10, window_bounds = array<i64: 1, 32>}, {pipeline_mode = #tpu.pipeline_mode<synchronous>, transform_indices = @transform_11, window_bounds = array<i64: 1, 32>}, {pipeline_mode = #tpu.pipeline_mode<synchronous>, transform_indices = @transform_12, window_bounds = array<i64: 1, 32>}, {pipeline_mode = #tpu.pipeline_mode<synchronous>, transform_indices = @transform_13, window_bounds = array<i64: 1, 32>}, {pipeline_mode = #tpu.pipeline_mode<synchronous>, transform_indices = @transform_14, window_bounds = array<i64: 1, 32>}, {transform_indices = @transform_15, window_bounds = array<i64: 1, 8, 32>}]} {
    %c0_i32 = arith.constant 0 : i32
    %0 = arith.cmpi eq, %arg1, %c0_i32 : i32
    %1 = arith.extui %0 : i1 to i32
    %c0_i32_0 = arith.constant 0 : i32
    %2 = arith.cmpi ne, %1, %c0_i32_0 : i32
    scf.if %2 {
      %c0_89 = arith.constant 0 : index
      %c0_90 = arith.constant 0 : index
      %c0_91 = arith.constant 0 : index
      %151 = vector.load %arg2[%c0_89, %c0_90, %c0_91] : memref<1x8x32xf32, #tpu.memory_space<vmem>>, vector<1x8x32xf32>
      %152 = vector.shape_cast %151 : vector<1x8x32xf32> to vector<8x32xf32>
      %c0_92 = arith.constant 0 : index
      %c0_93 = arith.constant 0 : index
      %153 = vector.load %arg5[%c0_92, %c0_93] : memref<32x64xf32, #tpu.memory_space<vmem>>, vector<32x64xf32>
      %cst_94 = arith.constant dense<0.000000e+00> : vector<8x64xf32>
      %154 = tpu.matmul %152, %153, %cst_94 {dimension_numbers = #tpu.dot_dimension_numbers<[1], [0], [0], [1], [0, 0, 1, 1], [], []>} : vector<8x32xf32>, vector<32x64xf32>, vector<8x64xf32> -> vector<8x64xf32>
      %c0_95 = arith.constant 0 : index
      %c0_96 = arith.constant 0 : index
      %155 = vector.load %arg6[%c0_95, %c0_96] : memref<1x64xf32, #tpu.memory_space<vmem>>, vector<1x64xf32>
      %156 = vector.broadcast %155 : vector<1x64xf32> to vector<8x64xf32>
      %157 = arith.addf %154, %156 : vector<8x64xf32>
      %c0_97 = arith.constant 0 : index
      %c0_98 = arith.constant 0 : index
      %158 = vector.load %arg18[%c0_97, %c0_98] : memref<8x64xf32, #tpu.memory_space<vmem>>, vector<8x64xf32>
      tpu.vector_store %arg18[%c0_97, %c0_98], %157 {strides = array<i32>} : memref<8x64xf32, #tpu.memory_space<vmem>>, vector<8x64xf32>,
    } else {
    }
    %c8_i32 = arith.constant 8 : i32
    %3 = arith.muli %arg1, %c8_i32 : i32
    %4 = tpu.assume_multiple %3, 8 : i32
    %c0 = arith.constant 0 : index
    %5 = arith.index_cast %4 : i32 to index
    %c0_1 = arith.constant 0 : index
    %6 = vector.load %arg2[%c0, %5, %c0_1] : memref<1x8x32xf32, #tpu.memory_space<vmem>>, vector<1x8x32xf32>
    %7 = vector.shape_cast %6 : vector<1x8x32xf32> to vector<8x32xf32>
    %c0_2 = arith.constant 0 : index
    %c0_3 = arith.constant 0 : index
    %8 = vector.load %arg3[%c0_2, %c0_3] : memref<32x32xf32, #tpu.memory_space<vmem>>, vector<32x32xf32>
    %cst = arith.constant dense<0.000000e+00> : vector<8x32xf32>
    %9 = tpu.matmul %7, %8, %cst {dimension_numbers = #tpu.dot_dimension_numbers<[1], [0], [0], [1], [0, 0, 1, 1], [], []>} : vector<8x32xf32>, vector<32x32xf32>, vector<8x32xf32> -> vector<8x32xf32>
    %c0_4 = arith.constant 0 : index
    %c0_5 = arith.constant 0 : index
    %10 = vector.load %arg4[%c0_4, %c0_5] : memref<1x32xf32, #tpu.memory_space<vmem>>, vector<1x32xf32>
    %11 = vector.broadcast %10 : vector<1x32xf32> to vector<8x32xf32>
    %12 = arith.addf %9, %11 : vector<8x32xf32>
    %cst_6 = arith.constant 0.353553385 : f32
    %13 = vector.broadcast %cst_6 : f32 to vector<8x32xf32>
    %14 = arith.mulf %12, %13 : vector<8x32xf32>
    %c0_7 = arith.constant 0 : index
    %c0_8 = arith.constant 0 : index
    %15 = vector.load %arg19[%c0_7, %c0_8] : memref<8x32xf32, #tpu.memory_space<vmem>>, vector<8x32xf32>
    tpu.vector_store %arg19[%c0_7, %c0_8], %14 {strides = array<i32>} : memref<8x32xf32, #tpu.memory_space<vmem>>, vector<8x32xf32>,
    %c0_9 = arith.constant 0 : index
    %c0_10 = arith.constant 0 : index
    %16 = vector.load %arg19[%c0_9, %c0_10] : memref<8x32xf32, #tpu.memory_space<vmem>>, vector<8x8xf32>
    %c0_11 = arith.constant 0 : index
    %c0_12 = arith.constant 0 : index
    %17 = vector.load %arg18[%c0_11, %c0_12] : memref<8x64xf32, #tpu.memory_space<vmem>>, vector<8x8xf32>
    %c0_13 = arith.constant 0 : index
    %c32 = arith.constant 32 : index
    %18 = vector.load %arg18[%c0_13, %c32] : memref<8x64xf32, #tpu.memory_space<vmem>>, vector<8x8xf32>
    %cst_14 = arith.constant dense<0.000000e+00> : vector<8x8xf32>
    %19 = tpu.matmul %16, %17, %cst_14 {dimension_numbers = #tpu.dot_dimension_numbers<[1], [1], [0], [0], [0, 0, 1, 0], [], []>} : vector<8x8xf32>, vector<8x8xf32>, vector<8x8xf32> -> vector<8x8xf32>
    %cst_15 = arith.constant dense<0xFF800000> : vector<8xf32>
    %20 = vector.multi_reduction <maximumf>, %19, %cst_15 [1] : vector<8x8xf32> to vector<8xf32>
    %21 = vector.shape_cast %20 : vector<8xf32> to vector<8x1xf32>
    %22 = vector.broadcast %21 : vector<8x1xf32> to vector<8x8xf32>
    %23 = arith.subf %19, %22 : vector<8x8xf32>
    %24 = math.exp %23 : vector<8x8xf32>
    %cst_16 = arith.constant dense<0.000000e+00> : vector<8xf32>
    %25 = vector.multi_reduction <add>, %24, %cst_16 [1] : vector<8x8xf32> to vector<8xf32>
    %26 = vector.shape_cast %25 : vector<8xf32> to vector<8x1xf32>
    %cst_17 = arith.constant dense<0.000000e+00> : vector<8x8xf32>
    %27 = tpu.matmul %24, %18, %cst_17 {dimension_numbers = #tpu.dot_dimension_numbers<[1], [0], [0], [1], [0, 0, 1, 1], [], []>} : vector<8x8xf32>, vector<8x8xf32>, vector<8x8xf32> -> vector<8x8xf32>
    %28 = tpu.reciprocal %26 : vector<8x1xf32> -> vector<8x1xf32>
    %29 = vector.broadcast %28 : vector<8x1xf32> to vector<8x8xf32>
    %30 = arith.mulf %27, %29 : vector<8x8xf32>
    %c0_18 = arith.constant 0 : index
    %c0_19 = arith.constant 0 : index
    %31 = vector.load %arg20[%c0_18, %c0_19] : memref<8x32xf32, #tpu.memory_space<vmem>>, vector<8x8xf32>
    tpu.vector_store %arg20[%c0_18, %c0_19], %30 {strides = array<i32>} : memref<8x32xf32, #tpu.memory_space<vmem>>, vector<8x8xf32>,
    %c0_20 = arith.constant 0 : index
    %c8 = arith.constant 8 : index
    %32 = vector.load %arg19[%c0_20, %c8] : memref<8x32xf32, #tpu.memory_space<vmem>>, vector<8x8xf32>
    %c0_21 = arith.constant 0 : index
    %c8_22 = arith.constant 8 : index
    %33 = vector.load %arg18[%c0_21, %c8_22] : memref<8x64xf32, #tpu.memory_space<vmem>>, vector<8x8xf32>
    %c0_23 = arith.constant 0 : index
    %c40 = arith.constant 40 : index
    %34 = vector.load %arg18[%c0_23, %c40] : memref<8x64xf32, #tpu.memory_space<vmem>>, vector<8x8xf32>
    %cst_24 = arith.constant dense<0.000000e+00> : vector<8x8xf32>
    %35 = tpu.matmul %32, %33, %cst_24 {dimension_numbers = #tpu.dot_dimension_numbers<[1], [1], [0], [0], [0, 0, 1, 0], [], []>} : vector<8x8xf32>, vector<8x8xf32>, vector<8x8xf32> -> vector<8x8xf32>
    %cst_25 = arith.constant dense<0xFF800000> : vector<8xf32>
    %36 = vector.multi_reduction <maximumf>, %35, %cst_25 [1] : vector<8x8xf32> to vector<8xf32>
    %37 = vector.shape_cast %36 : vector<8xf32> to vector<8x1xf32>
    %38 = vector.broadcast %37 : vector<8x1xf32> to vector<8x8xf32>
    %39 = arith.subf %35, %38 : vector<8x8xf32>
    %40 = math.exp %39 : vector<8x8xf32>
    %cst_26 = arith.constant dense<0.000000e+00> : vector<8xf32>
    %41 = vector.multi_reduction <add>, %40, %cst_26 [1] : vector<8x8xf32> to vector<8xf32>
    %42 = vector.shape_cast %41 : vector<8xf32> to vector<8x1xf32>
    %cst_27 = arith.constant dense<0.000000e+00> : vector<8x8xf32>
    %43 = tpu.matmul %40, %34, %cst_27 {dimension_numbers = #tpu.dot_dimension_numbers<[1], [0], [0], [1], [0, 0, 1, 1], [], []>} : vector<8x8xf32>, vector<8x8xf32>, vector<8x8xf32> -> vector<8x8xf32>
    %44 = tpu.reciprocal %42 : vector<8x1xf32> -> vector<8x1xf32>
    %45 = vector.broadcast %44 : vector<8x1xf32> to vector<8x8xf32>
    %46 = arith.mulf %43, %45 : vector<8x8xf32>
    %c0_28 = arith.constant 0 : index
    %c8_29 = arith.constant 8 : index
    %47 = vector.load %arg20[%c0_28, %c8_29] : memref<8x32xf32, #tpu.memory_space<vmem>>, vector<8x8xf32>
    tpu.vector_store %arg20[%c0_28, %c8_29], %46 {strides = array<i32>} : memref<8x32xf32, #tpu.memory_space<vmem>>, vector<8x8xf32>,
    %c0_30 = arith.constant 0 : index
    %c16 = arith.constant 16 : index
    %48 = vector.load %arg19[%c0_30, %c16] : memref<8x32xf32, #tpu.memory_space<vmem>>, vector<8x8xf32>
    %c0_31 = arith.constant 0 : index
    %c16_32 = arith.constant 16 : index
    %49 = vector.load %arg18[%c0_31, %c16_32] : memref<8x64xf32, #tpu.memory_space<vmem>>, vector<8x8xf32>
    %c0_33 = arith.constant 0 : index
    %c48 = arith.constant 48 : index
    %50 = vector.load %arg18[%c0_33, %c48] : memref<8x64xf32, #tpu.memory_space<vmem>>, vector<8x8xf32>
    %cst_34 = arith.constant dense<0.000000e+00> : vector<8x8xf32>
    %51 = tpu.matmul %48, %49, %cst_34 {dimension_numbers = #tpu.dot_dimension_numbers<[1], [1], [0], [0], [0, 0, 1, 0], [], []>} : vector<8x8xf32>, vector<8x8xf32>, vector<8x8xf32> -> vector<8x8xf32>
    %cst_35 = arith.constant dense<0xFF800000> : vector<8xf32>
    %52 = vector.multi_reduction <maximumf>, %51, %cst_35 [1] : vector<8x8xf32> to vector<8xf32>
    %53 = vector.shape_cast %52 : vector<8xf32> to vector<8x1xf32>
    %54 = vector.broadcast %53 : vector<8x1xf32> to vector<8x8xf32>
    %55 = arith.subf %51, %54 : vector<8x8xf32>
    %56 = math.exp %55 : vector<8x8xf32>
    %cst_36 = arith.constant dense<0.000000e+00> : vector<8xf32>
    %57 = vector.multi_reduction <add>, %56, %cst_36 [1] : vector<8x8xf32> to vector<8xf32>
    %58 = vector.shape_cast %57 : vector<8xf32> to vector<8x1xf32>
    %cst_37 = arith.constant dense<0.000000e+00> : vector<8x8xf32>
    %59 = tpu.matmul %56, %50, %cst_37 {dimension_numbers = #tpu.dot_dimension_numbers<[1], [0], [0], [1], [0, 0, 1, 1], [], []>} : vector<8x8xf32>, vector<8x8xf32>, vector<8x8xf32> -> vector<8x8xf32>
    %60 = tpu.reciprocal %58 : vector<8x1xf32> -> vector<8x1xf32>
    %61 = vector.broadcast %60 : vector<8x1xf32> to vector<8x8xf32>
    %62 = arith.mulf %59, %61 : vector<8x8xf32>
    %c0_38 = arith.constant 0 : index
    %c16_39 = arith.constant 16 : index
    %63 = vector.load %arg20[%c0_38, %c16_39] : memref<8x32xf32, #tpu.memory_space<vmem>>, vector<8x8xf32>
    tpu.vector_store %arg20[%c0_38, %c16_39], %62 {strides = array<i32>} : memref<8x32xf32, #tpu.memory_space<vmem>>, vector<8x8xf32>,
    %c0_40 = arith.constant 0 : index
    %c24 = arith.constant 24 : index
    %64 = vector.load %arg19[%c0_40, %c24] : memref<8x32xf32, #tpu.memory_space<vmem>>, vector<8x8xf32>
    %c0_41 = arith.constant 0 : index
    %c24_42 = arith.constant 24 : index
    %65 = vector.load %arg18[%c0_41, %c24_42] : memref<8x64xf32, #tpu.memory_space<vmem>>, vector<8x8xf32>
    %c0_43 = arith.constant 0 : index
    %c56 = arith.constant 56 : index
    %66 = vector.load %arg18[%c0_43, %c56] : memref<8x64xf32, #tpu.memory_space<vmem>>, vector<8x8xf32>
    %cst_44 = arith.constant dense<0.000000e+00> : vector<8x8xf32>
    %67 = tpu.matmul %64, %65, %cst_44 {dimension_numbers = #tpu.dot_dimension_numbers<[1], [1], [0], [0], [0, 0, 1, 0], [], []>} : vector<8x8xf32>, vector<8x8xf32>, vector<8x8xf32> -> vector<8x8xf32>
    %cst_45 = arith.constant dense<0xFF800000> : vector<8xf32>
    %68 = vector.multi_reduction <maximumf>, %67, %cst_45 [1] : vector<8x8xf32> to vector<8xf32>
    %69 = vector.shape_cast %68 : vector<8xf32> to vector<8x1xf32>
    %70 = vector.broadcast %69 : vector<8x1xf32> to vector<8x8xf32>
    %71 = arith.subf %67, %70 : vector<8x8xf32>
    %72 = math.exp %71 : vector<8x8xf32>
    %cst_46 = arith.constant dense<0.000000e+00> : vector<8xf32>
    %73 = vector.multi_reduction <add>, %72, %cst_46 [1] : vector<8x8xf32> to vector<8xf32>
    %74 = vector.shape_cast %73 : vector<8xf32> to vector<8x1xf32>
    %cst_47 = arith.constant dense<0.000000e+00> : vector<8x8xf32>
    %75 = tpu.matmul %72, %66, %cst_47 {dimension_numbers = #tpu.dot_dimension_numbers<[1], [0], [0], [1], [0, 0, 1, 1], [], []>} : vector<8x8xf32>, vector<8x8xf32>, vector<8x8xf32> -> vector<8x8xf32>
    %76 = tpu.reciprocal %74 : vector<8x1xf32> -> vector<8x1xf32>
    %77 = vector.broadcast %76 : vector<8x1xf32> to vector<8x8xf32>
    %78 = arith.mulf %75, %77 : vector<8x8xf32>
    %c0_48 = arith.constant 0 : index
    %c24_49 = arith.constant 24 : index
    %79 = vector.load %arg20[%c0_48, %c24_49] : memref<8x32xf32, #tpu.memory_space<vmem>>, vector<8x8xf32>
    tpu.vector_store %arg20[%c0_48, %c24_49], %78 {strides = array<i32>} : memref<8x32xf32, #tpu.memory_space<vmem>>, vector<8x8xf32>,
    %c0_50 = arith.constant 0 : index
    %c0_51 = arith.constant 0 : index
    %80 = vector.load %arg20[%c0_50, %c0_51] : memref<8x32xf32, #tpu.memory_space<vmem>>, vector<8x32xf32>
    %c0_52 = arith.constant 0 : index
    %c0_53 = arith.constant 0 : index
    %81 = vector.load %arg7[%c0_52, %c0_53] : memref<32x32xf32, #tpu.memory_space<vmem>>, vector<32x32xf32>
    %cst_54 = arith.constant dense<0.000000e+00> : vector<8x32xf32>
    %82 = tpu.matmul %80, %81, %cst_54 {dimension_numbers = #tpu.dot_dimension_numbers<[1], [0], [0], [1], [0, 0, 1, 1], [], []>} : vector<8x32xf32>, vector<32x32xf32>, vector<8x32xf32> -> vector<8x32xf32>
    %c0_55 = arith.constant 0 : index
    %c0_56 = arith.constant 0 : index
    %83 = vector.load %arg8[%c0_55, %c0_56] : memref<1x32xf32, #tpu.memory_space<vmem>>, vector<1x32xf32>
    %84 = vector.broadcast %83 : vector<1x32xf32> to vector<8x32xf32>
    %85 = arith.addf %82, %84 : vector<8x32xf32>
    %86 = arith.addf %7, %85 : vector<8x32xf32>
    %cst_57 = arith.constant dense<0.000000e+00> : vector<8xf32>
    %87 = vector.multi_reduction <add>, %86, %cst_57 [1] : vector<8x32xf32> to vector<8xf32>
    %88 = vector.shape_cast %87 : vector<8xf32> to vector<8x1xf32>
    %cst_58 = arith.constant 3.200000e+01 : f32
    %89 = vector.broadcast %cst_58 : f32 to vector<8x1xf32>
    %90 = arith.divf %88, %89 : vector<8x1xf32>
    %91 = vector.broadcast %90 : vector<8x1xf32> to vector<8x32xf32>
    %92 = arith.subf %86, %91 : vector<8x32xf32>
    %93 = arith.mulf %92, %92 : vector<8x32xf32>
    %cst_59 = arith.constant dense<0.000000e+00> : vector<8xf32>
    %94 = vector.multi_reduction <add>, %93, %cst_59 [1] : vector<8x32xf32> to vector<8xf32>
    %95 = vector.shape_cast %94 : vector<8xf32> to vector<8x1xf32>
    %cst_60 = arith.constant 3.200000e+01 : f32
    %96 = vector.broadcast %cst_60 : f32 to vector<8x1xf32>
    %97 = arith.divf %95, %96 : vector<8x1xf32>
    %98 = vector.broadcast %90 : vector<8x1xf32> to vector<8x32xf32>
    %99 = arith.subf %86, %98 : vector<8x32xf32>
    %cst_61 = arith.constant 9.99999974E-6 : f32
    %100 = vector.broadcast %cst_61 : f32 to vector<8x1xf32>
    %101 = arith.addf %97, %100 : vector<8x1xf32>
    %102 = math.rsqrt %101 : vector<8x1xf32>
    %103 = vector.broadcast %102 : vector<8x1xf32> to vector<8x32xf32>
    %104 = arith.mulf %99, %103 : vector<8x32xf32>
    %c0_62 = arith.constant 0 : index
    %c0_63 = arith.constant 0 : index
    %105 = vector.load %arg13[%c0_62, %c0_63] : memref<1x32xf32, #tpu.memory_space<vmem>>, vector<1x32xf32>
    %106 = vector.broadcast %105 : vector<1x32xf32> to vector<8x32xf32>
    %107 = arith.mulf %104, %106 : vector<8x32xf32>
    %c0_64 = arith.constant 0 : index
    %c0_65 = arith.constant 0 : index
    %108 = vector.load %arg14[%c0_64, %c0_65] : memref<1x32xf32, #tpu.memory_space<vmem>>, vector<1x32xf32>
    %109 = vector.broadcast %108 : vector<1x32xf32> to vector<8x32xf32>
    %110 = arith.addf %107, %109 : vector<8x32xf32>
    %c0_66 = arith.constant 0 : index
    %c0_67 = arith.constant 0 : index
    %111 = vector.load %arg9[%c0_66, %c0_67] : memref<32x64xf32, #tpu.memory_space<vmem>>, vector<32x64xf32>
    %cst_68 = arith.constant dense<0.000000e+00> : vector<8x64xf32>
    %112 = tpu.matmul %110, %111, %cst_68 {dimension_numbers = #tpu.dot_dimension_numbers<[1], [0], [0], [1], [0, 0, 1, 1], [], []>} : vector<8x32xf32>, vector<32x64xf32>, vector<8x64xf32> -> vector<8x64xf32>
    %c0_69 = arith.constant 0 : index
    %c0_70 = arith.constant 0 : index
    %113 = vector.load %arg10[%c0_69, %c0_70] : memref<1x64xf32, #tpu.memory_space<vmem>>, vector<1x64xf32>
    %114 = vector.broadcast %113 : vector<1x64xf32> to vector<8x64xf32>
    %115 = arith.addf %112, %114 : vector<8x64xf32>
    %cst_71 = arith.constant 0.000000e+00 : f32
    %116 = vector.broadcast %cst_71 : f32 to vector<8x64xf32>
    %117 = arith.maximumf %115, %116 : vector<8x64xf32>
    %c0_72 = arith.constant 0 : index
    %c0_73 = arith.constant 0 : index
    %118 = vector.load %arg11[%c0_72, %c0_73] : memref<64x32xf32, #tpu.memory_space<vmem>>, vector<64x32xf32>
    %cst_74 = arith.constant dense<0.000000e+00> : vector<8x32xf32>
    %119 = tpu.matmul %117, %118, %cst_74 {dimension_numbers = #tpu.dot_dimension_numbers<[1], [0], [0], [1], [0, 0, 1, 1], [], []>} : vector<8x64xf32>, vector<64x32xf32>, vector<8x32xf32> -> vector<8x32xf32>
    %c0_75 = arith.constant 0 : index
    %c0_76 = arith.constant 0 : index
    %120 = vector.load %arg12[%c0_75, %c0_76] : memref<1x32xf32, #tpu.memory_space<vmem>>, vector<1x32xf32>
    %121 = vector.broadcast %120 : vector<1x32xf32> to vector<8x32xf32>
    %122 = arith.addf %119, %121 : vector<8x32xf32>
    %123 = arith.addf %110, %122 : vector<8x32xf32>
    %cst_77 = arith.constant dense<0.000000e+00> : vector<8xf32>
    %124 = vector.multi_reduction <add>, %123, %cst_77 [1] : vector<8x32xf32> to vector<8xf32>
    %125 = vector.shape_cast %124 : vector<8xf32> to vector<8x1xf32>
    %cst_78 = arith.constant 3.200000e+01 : f32
    %126 = vector.broadcast %cst_78 : f32 to vector<8x1xf32>
    %127 = arith.divf %125, %126 : vector<8x1xf32>
    %128 = vector.broadcast %127 : vector<8x1xf32> to vector<8x32xf32>
    %129 = arith.subf %123, %128 : vector<8x32xf32>
    %130 = arith.mulf %129, %129 : vector<8x32xf32>
    %cst_79 = arith.constant dense<0.000000e+00> : vector<8xf32>
    %131 = vector.multi_reduction <add>, %130, %cst_79 [1] : vector<8x32xf32> to vector<8xf32>
    %132 = vector.shape_cast %131 : vector<8xf32> to vector<8x1xf32>
    %cst_80 = arith.constant 3.200000e+01 : f32
    %133 = vector.broadcast %cst_80 : f32 to vector<8x1xf32>
    %134 = arith.divf %132, %133 : vector<8x1xf32>
    %135 = vector.broadcast %127 : vector<8x1xf32> to vector<8x32xf32>
    %136 = arith.subf %123, %135 : vector<8x32xf32>
    %cst_81 = arith.constant 9.99999974E-6 : f32
    %137 = vector.broadcast %cst_81 : f32 to vector<8x1xf32>
    %138 = arith.addf %134, %137 : vector<8x1xf32>
    %139 = math.rsqrt %138 : vector<8x1xf32>
    %140 = vector.broadcast %139 : vector<8x1xf32> to vector<8x32xf32>
    %141 = arith.mulf %136, %140 : vector<8x32xf32>
    %c0_82 = arith.constant 0 : index
    %c0_83 = arith.constant 0 : index
    %142 = vector.load %arg15[%c0_82, %c0_83] : memref<1x32xf32, #tpu.memory_space<vmem>>, vector<1x32xf32>
    %143 = vector.broadcast %142 : vector<1x32xf32> to vector<8x32xf32>
    %144 = arith.mulf %141, %143 : vector<8x32xf32>
    %c0_84 = arith.constant 0 : index
    %c0_85 = arith.constant 0 : index
    %145 = vector.load %arg16[%c0_84, %c0_85] : memref<1x32xf32, #tpu.memory_space<vmem>>, vector<1x32xf32>
    %146 = vector.broadcast %145 : vector<1x32xf32> to vector<8x32xf32>
    %147 = arith.addf %144, %146 : vector<8x32xf32>
    %c0_86 = arith.constant 0 : index
    %c0_87 = arith.constant 0 : index
    %c0_88 = arith.constant 0 : index
    %148 = vector.load %arg17[%c0_86, %c0_87, %c0_88] : memref<1x8x32xf32, #tpu.memory_space<vmem>>, vector<1x8x32xf32>
    %149 = vector.shape_cast %148 : vector<1x8x32xf32> to vector<8x32xf32>
    %150 = vector.shape_cast %147 : vector<8x32xf32> to vector<1x8x32xf32>
    tpu.vector_store %arg17[%c0_86, %c0_87, %c0_88], %150 {strides = array<i32>} : memref<1x8x32xf32, #tpu.memory_space<vmem>>, vector<1x8x32xf32>,
    return
  }
  func.func @transform_0(%arg0: i32, %arg1: i32) -> (i32, i32, i32) {
    %c0_i32 = arith.constant 0 : i32
    %c0_i32_0 = arith.constant 0 : i32
    %c0_i32_1 = arith.constant 0 : i32
    return %arg0, %c0_i32, %c0_i32_0 : i32, i32, i32
  }
  func.func @transform_1(%arg0: i32, %arg1: i32) -> (i32, i32) {
    %c0_i32 = arith.constant 0 : i32
    %c0_i32_0 = arith.constant 0 : i32
    %c0_i32_1 = arith.constant 0 : i32
    return %c0_i32, %c0_i32_0 : i32, i32
  }
  func.func @transform_2(%arg0: i32, %arg1: i32) -> (i32, i32) {
    %c0_i32 = arith.constant 0 : i32
    %c0_i32_0 = arith.constant 0 : i32
    %c0_i32_1 = arith.constant 0 : i32
    return %c0_i32, %c0_i32_0 : i32, i32
  }
  func.func @transform_3(%arg0: i32, %arg1: i32) -> (i32, i32) {
    %c0_i32 = arith.constant 0 : i32
    %c0_i32_0 = arith.constant 0 : i32
    %c0_i32_1 = arith.constant 0 : i32
    return %c0_i32, %c0_i32_0 : i32, i32
  }
  func.func @transform_4(%arg0: i32, %arg1: i32) -> (i32, i32) {
    %c0_i32 = arith.constant 0 : i32
    %c0_i32_0 = arith.constant 0 : i32
    %c0_i32_1 = arith.constant 0 : i32
    return %c0_i32, %c0_i32_0 : i32, i32
  }
  func.func @transform_5(%arg0: i32, %arg1: i32) -> (i32, i32) {
    %c0_i32 = arith.constant 0 : i32
    %c0_i32_0 = arith.constant 0 : i32
    %c0_i32_1 = arith.constant 0 : i32
    return %c0_i32, %c0_i32_0 : i32, i32
  }
  func.func @transform_6(%arg0: i32, %arg1: i32) -> (i32, i32) {
    %c0_i32 = arith.constant 0 : i32
    %c0_i32_0 = arith.constant 0 : i32
    %c0_i32_1 = arith.constant 0 : i32
    return %c0_i32, %c0_i32_0 : i32, i32
  }
  func.func @transform_7(%arg0: i32, %arg1: i32) -> (i32, i32) {
    %c0_i32 = arith.constant 0 : i32
    %c0_i32_0 = arith.constant 0 : i32
    %c0_i32_1 = arith.constant 0 : i32
    return %c0_i32, %c0_i32_0 : i32, i32
  }
  func.func @transform_8(%arg0: i32, %arg1: i32) -> (i32, i32) {
    %c0_i32 = arith.constant 0 : i32
    %c0_i32_0 = arith.constant 0 : i32
    %c0_i32_1 = arith.constant 0 : i32
    return %c0_i32, %c0_i32_0 : i32, i32
  }
  func.func @transform_9(%arg0: i32, %arg1: i32) -> (i32, i32) {
    %c0_i32 = arith.constant 0 : i32
    %c0_i32_0 = arith.constant 0 : i32
    %c0_i32_1 = arith.constant 0 : i32
    return %c0_i32, %c0_i32_0 : i32, i32
  }
  func.func @transform_10(%arg0: i32, %arg1: i32) -> (i32, i32) {
    %c0_i32 = arith.constant 0 : i32
    %c0_i32_0 = arith.constant 0 : i32
    %c0_i32_1 = arith.constant 0 : i32
    return %c0_i32, %c0_i32_0 : i32, i32
  }
  func.func @transform_11(%arg0: i32, %arg1: i32) -> (i32, i32) {
    %c0_i32 = arith.constant 0 : i32
    %c0_i32_0 = arith.constant 0 : i32
    %c0_i32_1 = arith.constant 0 : i32
    return %c0_i32, %c0_i32_0 : i32, i32
  }
  func.func @transform_12(%arg0: i32, %arg1: i32) -> (i32, i32) {
    %c0_i32 = arith.constant 0 : i32
    %c0_i32_0 = arith.constant 0 : i32
    %c0_i32_1 = arith.constant 0 : i32
    return %c0_i32, %c0_i32_0 : i32, i32
  }
  func.func @transform_13(%arg0: i32, %arg1: i32) -> (i32, i32) {
    %c0_i32 = arith.constant 0 : i32
    %c0_i32_0 = arith.constant 0 : i32
    %c0_i32_1 = arith.constant 0 : i32
    return %c0_i32, %c0_i32_0 : i32, i32
  }
  func.func @transform_14(%arg0: i32, %arg1: i32) -> (i32, i32) {
    %c0_i32 = arith.constant 0 : i32
    %c0_i32_0 = arith.constant 0 : i32
    %c0_i32_1 = arith.constant 0 : i32
    return %c0_i32, %c0_i32_0 : i32, i32
  }
  func.func @transform_15(%arg0: i32, %arg1: i32) -> (i32, i32, i32) {
    %c0_i32 = arith.constant 0 : i32
    %c0_i32_0 = arith.constant 0 : i32
    return %arg0, %arg1, %c0_i32 : i32, i32, i32
  }
}

module attributes {stable_mosaic.version = 11 : i64} {
  func.func @encoder_layer_kernel(%arg0: i32, %arg1: i32, %arg2: memref<1x8x32xf32, #tpu.memory_space<vmem>>, %arg3: memref<32x32xf32, #tpu.memory_space<vmem>>, %arg4: memref<1x32xf32, #tpu.memory_space<vmem>>, %arg5: memref<32x64xf32, #tpu.memory_space<vmem>>, %arg6: memref<1x64xf32, #tpu.memory_space<vmem>>, %arg7: memref<32x32xf32, #tpu.memory_space<vmem>>, %arg8: memref<1x32xf32, #tpu.memory_space<vmem>>, %arg9: memref<32x64xf32, #tpu.memory_space<vmem>>, %arg10: memref<1x64xf32, #tpu.memory_space<vmem>>, %arg11: memref<64x32xf32, #tpu.memory_space<vmem>>, %arg12: memref<1x32xf32, #tpu.memory_space<vmem>>, %arg13: memref<1x32xf32, #tpu.memory_space<vmem>>, %arg14: memref<1x32xf32, #tpu.memory_space<vmem>>, %arg15: memref<1x32xf32, #tpu.memory_space<vmem>>, %arg16: memref<1x32xf32, #tpu.memory_space<vmem>>, %arg17: memref<1x8x32xf32, #tpu.memory_space<vmem>>, %arg18: memref<8x64xf32, #tpu.memory_space<vmem>>, %arg19: memref<8x32xf32, #tpu.memory_space<vmem>>, %arg20: memref<8x32xf32, #tpu.memory_space<vmem>>) attributes {dimension_semantics = [#tpu.dimension_semantics<parallel>, #tpu.dimension_semantics<arbitrary>], iteration_bounds = array<i64: 2, 1>, scalar_prefetch = 0 : i64, scratch_operands = 3 : i64, tpu.core_type = #tpu.core_type<tc>, window_params = [{transform_indices = @transform_0, window_bounds = array<i64: 1, 8, 32>}, {pipeline_mode = #tpu.pipeline_mode<synchronous>, transform_indices = @transform_1, window_bounds = array<i64: 32, 32>}, {pipeline_mode = #tpu.pipeline_mode<synchronous>, transform_indices = @transform_2, window_bounds = array<i64: 1, 32>}, {pipeline_mode = #tpu.pipeline_mode<synchronous>, transform_indices = @transform_3, window_bounds = array<i64: 32, 64>}, {pipeline_mode = #tpu.pipeline_mode<synchronous>, transform_indices = @transform_4, window_bounds = array<i64: 1, 64>}, {pipeline_mode = #tpu.pipeline_mode<synchronous>, transform_indices = @transform_5, window_bounds = array<i64: 32, 32>}, {pipeline_mode = #tpu.pipeline_mode<synchronous>, transform_indices = @transform_6, window_bounds = array<i64: 1, 32>}, {pipeline_mode = #tpu.pipeline_mode<synchronous>, transform_indices = @transform_7, window_bounds = array<i64: 32, 64>}, {pipeline_mode = #tpu.pipeline_mode<synchronous>, transform_indices = @transform_8, window_bounds = array<i64: 1, 64>}, {pipeline_mode = #tpu.pipeline_mode<synchronous>, transform_indices = @transform_9, window_bounds = array<i64: 64, 32>}, {pipeline_mode = #tpu.pipeline_mode<synchronous>, transform_indices = @transform_10, window_bounds = array<i64: 1, 32>}, {pipeline_mode = #tpu.pipeline_mode<synchronous>, transform_indices = @transform_11, window_bounds = array<i64: 1, 32>}, {pipeline_mode = #tpu.pipeline_mode<synchronous>, transform_indices = @transform_12, window_bounds = array<i64: 1, 32>}, {pipeline_mode = #tpu.pipeline_mode<synchronous>, transform_indices = @transform_13, window_bounds = array<i64: 1, 32>}, {pipeline_mode = #tpu.pipeline_mode<synchronous>, transform_indices = @transform_14, window_bounds = array<i64: 1, 32>}, {transform_indices = @transform_15, window_bounds = array<i64: 1, 8, 32>}]} {
    %c0_i32 = arith.constant 0 : i32
    %0 = arith.cmpi eq, %arg1, %c0_i32 : i32
    %1 = arith.extui %0 : i1 to i32
    %c0_i32_0 = arith.constant 0 : i32
    %2 = arith.cmpi ne, %1, %c0_i32_0 : i32
    scf.if %2 {
      %c0_89 = arith.constant 0 : index
      %c0_90 = arith.constant 0 : index
      %c0_91 = arith.constant 0 : index
      %151 = vector.load %arg2[%c0_89, %c0_90, %c0_91] : memref<1x8x32xf32, #tpu.memory_space<vmem>>, vector<1x8x32xf32>
      %152 = vector.shape_cast %151 : vector<1x8x32xf32> to vector<8x32xf32>
      %c0_92 = arith.constant 0 : index
      %c0_93 = arith.constant 0 : index
      %153 = vector.load %arg5[%c0_92, %c0_93] : memref<32x64xf32, #tpu.memory_space<vmem>>, vector<32x64xf32>
      %cst_94 = arith.constant dense<0.000000e+00> : vector<8x64xf32>
      %154 = tpu.matmul %152, %153, %cst_94 {dimension_numbers = #tpu.dot_dimension_numbers<[1], [0], [0], [1], [0, 0, 1, 1], [], []>} : vector<8x32xf32>, vector<32x64xf32>, vector<8x64xf32> -> vector<8x64xf32>
      %c0_95 = arith.constant 0 : index
      %c0_96 = arith.constant 0 : index
      %155 = vector.load %arg6[%c0_95, %c0_96] : memref<1x64xf32, #tpu.memory_space<vmem>>, vector<1x64xf32>
      %156 = vector.broadcast %155 : vector<1x64xf32> to vector<8x64xf32>
      %157 = arith.addf %154, %156 : vector<8x64xf32>
      %c0_97 = arith.constant 0 : index
      %c0_98 = arith.constant 0 : index
      %158 = vector.load %arg18[%c0_97, %c0_98] : memref<8x64xf32, #tpu.memory_space<vmem>>, vector<8x64xf32>
      tpu.vector_store %arg18[%c0_97, %c0_98], %157 {strides = array<i32>} : memref<8x64xf32, #tpu.memory_space<vmem>>, vector<8x64xf32>,
    } else {
    }
    %c8_i32 = arith.constant 8 : i32
    %3 = arith.muli %arg1, %c8_i32 : i32
    %4 = tpu.assume_multiple %3, 8 : i32
    %c0 = arith.constant 0 : index
    %5 = arith.index_cast %4 : i32 to index
    %c0_1 = arith.constant 0 : index
    %6 = vector.load %arg2[%c0, %5, %c0_1] : memref<1x8x32xf32, #tpu.memory_space<vmem>>, vector<1x8x32xf32>
    %7 = vector.shape_cast %6 : vector<1x8x32xf32> to vector<8x32xf32>
    %c0_2 = arith.constant 0 : index
    %c0_3 = arith.constant 0 : index
    %8 = vector.load %arg3[%c0_2, %c0_3] : memref<32x32xf32, #tpu.memory_space<vmem>>, vector<32x32xf32>
    %cst = arith.constant dense<0.000000e+00> : vector<8x32xf32>
    %9 = tpu.matmul %7, %8, %cst {dimension_numbers = #tpu.dot_dimension_numbers<[1], [0], [0], [1], [0, 0, 1, 1], [], []>} : vector<8x32xf32>, vector<32x32xf32>, vector<8x32xf32> -> vector<8x32xf32>
    %c0_4 = arith.constant 0 : index
    %c0_5 = arith.constant 0 : index
    %10 = vector.load %arg4[%c0_4, %c0_5] : memref<1x32xf32, #tpu.memory_space<vmem>>, vector<1x32xf32>
    %11 = vector.broadcast %10 : vector<1x32xf32> to vector<8x32xf32>
    %12 = arith.addf %9, %11 : vector<8x32xf32>
    %cst_6 = arith.constant 0.353553385 : f32
    %13 = vector.broadcast %cst_6 : f32 to vector<8x32xf32>
    %14 = arith.mulf %12, %13 : vector<8x32xf32>
    %c0_7 = arith.constant 0 : index
    %c0_8 = arith.constant 0 : index
    %15 = vector.load %arg19[%c0_7, %c0_8] : memref<8x32xf32, #tpu.memory_space<vmem>>, vector<8x32xf32>
    tpu.vector_store %arg19[%c0_7, %c0_8], %14 {strides = array<i32>} : memref<8x32xf32, #tpu.memory_space<vmem>>, vector<8x32xf32>,
    %c0_9 = arith.constant 0 : index
    %c0_10 = arith.constant 0 : index
    %16 = vector.load %arg19[%c0_9, %c0_10] : memref<8x32xf32, #tpu.memory_space<vmem>>, vector<8x8xf32>
    %c0_11 = arith.constant 0 : index
    %c0_12 = arith.constant 0 : index
    %17 = vector.load %arg18[%c0_11, %c0_12] : memref<8x64xf32, #tpu.memory_space<vmem>>, vector<8x8xf32>
    %c0_13 = arith.constant 0 : index
    %c32 = arith.constant 32 : index
    %18 = vector.load %arg18[%c0_13, %c32] : memref<8x64xf32, #tpu.memory_space<vmem>>, vector<8x8xf32>
    %cst_14 = arith.constant dense<0.000000e+00> : vector<8x8xf32>
    %19 = tpu.matmul %16, %17, %cst_14 {dimension_numbers = #tpu.dot_dimension_numbers<[1], [1], [0], [0], [0, 0, 1, 0], [], []>} : vector<8x8xf32>, vector<8x8xf32>, vector<8x8xf32> -> vector<8x8xf32>
    %cst_15 = arith.constant dense<0xFF800000> : vector<8xf32>
    %20 = vector.multi_reduction <maximumf>, %19, %cst_15 [1] : vector<8x8xf32> to vector<8xf32>
    %21 = vector.shape_cast %20 : vector<8xf32> to vector<8x1xf32>
    %22 = vector.broadcast %21 : vector<8x1xf32> to vector<8x8xf32>
    %23 = arith.subf %19, %22 : vector<8x8xf32>
    %24 = math.exp %23 : vector<8x8xf32>
    %cst_16 = arith.constant dense<0.000000e+00> : vector<8xf32>
    %25 = vector.multi_reduction <add>, %24, %cst_16 [1] : vector<8x8xf32> to vector<8xf32>
    %26 = vector.shape_cast %25 : vector<8xf32> to vector<8x1xf32>
    %cst_17 = arith.constant dense<0.000000e+00> : vector<8x8xf32>
    %27 = tpu.matmul %24, %18, %cst_17 {dimension_numbers = #tpu.dot_dimension_numbers<[1], [0], [0], [1], [0, 0, 1, 1], [], []>} : vector<8x8xf32>, vector<8x8xf32>, vector<8x8xf32> -> vector<8x8xf32>
    %28 = tpu.reciprocal %26 : vector<8x1xf32> -> vector<8x1xf32>
    %29 = vector.broadcast %28 : vector<8x1xf32> to vector<8x8xf32>
    %30 = arith.mulf %27, %29 : vector<8x8xf32>
    %c0_18 = arith.constant 0 : index
    %c0_19 = arith.constant 0 : index
    %31 = vector.load %arg20[%c0_18, %c0_19] : memref<8x32xf32, #tpu.memory_space<vmem>>, vector<8x8xf32>
    tpu.vector_store %arg20[%c0_18, %c0_19], %30 {strides = array<i32>} : memref<8x32xf32, #tpu.memory_space<vmem>>, vector<8x8xf32>,
    %c0_20 = arith.constant 0 : index
    %c8 = arith.constant 8 : index
    %32 = vector.load %arg19[%c0_20, %c8] : memref<8x32xf32, #tpu.memory_space<vmem>>, vector<8x8xf32>
    %c0_21 = arith.constant 0 : index
    %c8_22 = arith.constant 8 : index
    %33 = vector.load %arg18[%c0_21, %c8_22] : memref<8x64xf32, #tpu.memory_space<vmem>>, vector<8x8xf32>
    %c0_23 = arith.constant 0 : index
    %c40 = arith.constant 40 : index
    %34 = vector.load %arg18[%c0_23, %c40] : memref<8x64xf32, #tpu.memory_space<vmem>>, vector<8x8xf32>
    %cst_24 = arith.constant dense<0.000000e+00> : vector<8x8xf32>
    %35 = tpu.matmul %32, %33, %cst_24 {dimension_numbers = #tpu.dot_dimension_numbers<[1], [1], [0], [0], [0, 0, 1, 0], [], []>} : vector<8x8xf32>, vector<8x8xf32>, vector<8x8xf32> -> vector<8x8xf32>
    %cst_25 = arith.constant dense<0xFF800000> : vector<8xf32>
    %36 = vector.multi_reduction <maximumf>, %35, %cst_25 [1] : vector<8x8xf32> to vector<8xf32>
    %37 = vector.shape_cast %36 : vector<8xf32> to vector<8x1xf32>
    %38 = vector.broadcast %37 : vector<8x1xf32> to vector<8x8xf32>
    %39 = arith.subf %35, %38 : vector<8x8xf32>
    %40 = math.exp %39 : vector<8x8xf32>
    %cst_26 = arith.constant dense<0.000000e+00> : vector<8xf32>
    %41 = vector.multi_reduction <add>, %40, %cst_26 [1] : vector<8x8xf32> to vector<8xf32>
    %42 = vector.shape_cast %41 : vector<8xf32> to vector<8x1xf32>
    %cst_27 = arith.constant dense<0.000000e+00> : vector<8x8xf32>
    %43 = tpu.matmul %40, %34, %cst_27 {dimension_numbers = #tpu.dot_dimension_numbers<[1], [0], [0], [1], [0, 0, 1, 1], [], []>} : vector<8x8xf32>, vector<8x8xf32>, vector<8x8xf32> -> vector<8x8xf32>
    %44 = tpu.reciprocal %42 : vector<8x1xf32> -> vector<8x1xf32>
    %45 = vector.broadcast %44 : vector<8x1xf32> to vector<8x8xf32>
    %46 = arith.mulf %43, %45 : vector<8x8xf32>
    %c0_28 = arith.constant 0 : index
    %c8_29 = arith.constant 8 : index
    %47 = vector.load %arg20[%c0_28, %c8_29] : memref<8x32xf32, #tpu.memory_space<vmem>>, vector<8x8xf32>
    tpu.vector_store %arg20[%c0_28, %c8_29], %46 {strides = array<i32>} : memref<8x32xf32, #tpu.memory_space<vmem>>, vector<8x8xf32>,
    %c0_30 = arith.constant 0 : index
    %c16 = arith.constant 16 : index
    %48 = vector.load %arg19[%c0_30, %c16] : memref<8x32xf32, #tpu.memory_space<vmem>>, vector<8x8xf32>
    %c0_31 = arith.constant 0 : index
    %c16_32 = arith.constant 16 : index
    %49 = vector.load %arg18[%c0_31, %c16_32] : memref<8x64xf32, #tpu.memory_space<vmem>>, vector<8x8xf32>
    %c0_33 = arith.constant 0 : index
    %c48 = arith.constant 48 : index
    %50 = vector.load %arg18[%c0_33, %c48] : memref<8x64xf32, #tpu.memory_space<vmem>>, vector<8x8xf32>
    %cst_34 = arith.constant dense<0.000000e+00> : vector<8x8xf32>
    %51 = tpu.matmul %48, %49, %cst_34 {dimension_numbers = #tpu.dot_dimension_numbers<[1], [1], [0], [0], [0, 0, 1, 0], [], []>} : vector<8x8xf32>, vector<8x8xf32>, vector<8x8xf32> -> vector<8x8xf32>
    %cst_35 = arith.constant dense<0xFF800000> : vector<8xf32>
    %52 = vector.multi_reduction <maximumf>, %51, %cst_35 [1] : vector<8x8xf32> to vector<8xf32>
    %53 = vector.shape_cast %52 : vector<8xf32> to vector<8x1xf32>
    %54 = vector.broadcast %53 : vector<8x1xf32> to vector<8x8xf32>
    %55 = arith.subf %51, %54 : vector<8x8xf32>
    %56 = math.exp %55 : vector<8x8xf32>
    %cst_36 = arith.constant dense<0.000000e+00> : vector<8xf32>
    %57 = vector.multi_reduction <add>, %56, %cst_36 [1] : vector<8x8xf32> to vector<8xf32>
    %58 = vector.shape_cast %57 : vector<8xf32> to vector<8x1xf32>
    %cst_37 = arith.constant dense<0.000000e+00> : vector<8x8xf32>
    %59 = tpu.matmul %56, %50, %cst_37 {dimension_numbers = #tpu.dot_dimension_numbers<[1], [0], [0], [1], [0, 0, 1, 1], [], []>} : vector<8x8xf32>, vector<8x8xf32>, vector<8x8xf32> -> vector<8x8xf32>
    %60 = tpu.reciprocal %58 : vector<8x1xf32> -> vector<8x1xf32>
    %61 = vector.broadcast %60 : vector<8x1xf32> to vector<8x8xf32>
    %62 = arith.mulf %59, %61 : vector<8x8xf32>
    %c0_38 = arith.constant 0 : index
    %c16_39 = arith.constant 16 : index
    %63 = vector.load %arg20[%c0_38, %c16_39] : memref<8x32xf32, #tpu.memory_space<vmem>>, vector<8x8xf32>
    tpu.vector_store %arg20[%c0_38, %c16_39], %62 {strides = array<i32>} : memref<8x32xf32, #tpu.memory_space<vmem>>, vector<8x8xf32>,
    %c0_40 = arith.constant 0 : index
    %c24 = arith.constant 24 : index
    %64 = vector.load %arg19[%c0_40, %c24] : memref<8x32xf32, #tpu.memory_space<vmem>>, vector<8x8xf32>
    %c0_41 = arith.constant 0 : index
    %c24_42 = arith.constant 24 : index
    %65 = vector.load %arg18[%c0_41, %c24_42] : memref<8x64xf32, #tpu.memory_space<vmem>>, vector<8x8xf32>
    %c0_43 = arith.constant 0 : index
    %c56 = arith.constant 56 : index
    %66 = vector.load %arg18[%c0_43, %c56] : memref<8x64xf32, #tpu.memory_space<vmem>>, vector<8x8xf32>
    %cst_44 = arith.constant dense<0.000000e+00> : vector<8x8xf32>
    %67 = tpu.matmul %64, %65, %cst_44 {dimension_numbers = #tpu.dot_dimension_numbers<[1], [1], [0], [0], [0, 0, 1, 0], [], []>} : vector<8x8xf32>, vector<8x8xf32>, vector<8x8xf32> -> vector<8x8xf32>
    %cst_45 = arith.constant dense<0xFF800000> : vector<8xf32>
    %68 = vector.multi_reduction <maximumf>, %67, %cst_45 [1] : vector<8x8xf32> to vector<8xf32>
    %69 = vector.shape_cast %68 : vector<8xf32> to vector<8x1xf32>
    %70 = vector.broadcast %69 : vector<8x1xf32> to vector<8x8xf32>
    %71 = arith.subf %67, %70 : vector<8x8xf32>
    %72 = math.exp %71 : vector<8x8xf32>
    %cst_46 = arith.constant dense<0.000000e+00> : vector<8xf32>
    %73 = vector.multi_reduction <add>, %72, %cst_46 [1] : vector<8x8xf32> to vector<8xf32>
    %74 = vector.shape_cast %73 : vector<8xf32> to vector<8x1xf32>
    %cst_47 = arith.constant dense<0.000000e+00> : vector<8x8xf32>
    %75 = tpu.matmul %72, %66, %cst_47 {dimension_numbers = #tpu.dot_dimension_numbers<[1], [0], [0], [1], [0, 0, 1, 1], [], []>} : vector<8x8xf32>, vector<8x8xf32>, vector<8x8xf32> -> vector<8x8xf32>
    %76 = tpu.reciprocal %74 : vector<8x1xf32> -> vector<8x1xf32>
    %77 = vector.broadcast %76 : vector<8x1xf32> to vector<8x8xf32>
    %78 = arith.mulf %75, %77 : vector<8x8xf32>
    %c0_48 = arith.constant 0 : index
    %c24_49 = arith.constant 24 : index
    %79 = vector.load %arg20[%c0_48, %c24_49] : memref<8x32xf32, #tpu.memory_space<vmem>>, vector<8x8xf32>
    tpu.vector_store %arg20[%c0_48, %c24_49], %78 {strides = array<i32>} : memref<8x32xf32, #tpu.memory_space<vmem>>, vector<8x8xf32>,
    %c0_50 = arith.constant 0 : index
    %c0_51 = arith.constant 0 : index
    %80 = vector.load %arg20[%c0_50, %c0_51] : memref<8x32xf32, #tpu.memory_space<vmem>>, vector<8x32xf32>
    %c0_52 = arith.constant 0 : index
    %c0_53 = arith.constant 0 : index
    %81 = vector.load %arg7[%c0_52, %c0_53] : memref<32x32xf32, #tpu.memory_space<vmem>>, vector<32x32xf32>
    %cst_54 = arith.constant dense<0.000000e+00> : vector<8x32xf32>
    %82 = tpu.matmul %80, %81, %cst_54 {dimension_numbers = #tpu.dot_dimension_numbers<[1], [0], [0], [1], [0, 0, 1, 1], [], []>} : vector<8x32xf32>, vector<32x32xf32>, vector<8x32xf32> -> vector<8x32xf32>
    %c0_55 = arith.constant 0 : index
    %c0_56 = arith.constant 0 : index
    %83 = vector.load %arg8[%c0_55, %c0_56] : memref<1x32xf32, #tpu.memory_space<vmem>>, vector<1x32xf32>
    %84 = vector.broadcast %83 : vector<1x32xf32> to vector<8x32xf32>
    %85 = arith.addf %82, %84 : vector<8x32xf32>
    %86 = arith.addf %7, %85 : vector<8x32xf32>
    %cst_57 = arith.constant dense<0.000000e+00> : vector<8xf32>
    %87 = vector.multi_reduction <add>, %86, %cst_57 [1] : vector<8x32xf32> to vector<8xf32>
    %88 = vector.shape_cast %87 : vector<8xf32> to vector<8x1xf32>
    %cst_58 = arith.constant 3.200000e+01 : f32
    %89 = vector.broadcast %cst_58 : f32 to vector<8x1xf32>
    %90 = arith.divf %88, %89 : vector<8x1xf32>
    %91 = vector.broadcast %90 : vector<8x1xf32> to vector<8x32xf32>
    %92 = arith.subf %86, %91 : vector<8x32xf32>
    %93 = arith.mulf %92, %92 : vector<8x32xf32>
    %cst_59 = arith.constant dense<0.000000e+00> : vector<8xf32>
    %94 = vector.multi_reduction <add>, %93, %cst_59 [1] : vector<8x32xf32> to vector<8xf32>
    %95 = vector.shape_cast %94 : vector<8xf32> to vector<8x1xf32>
    %cst_60 = arith.constant 3.200000e+01 : f32
    %96 = vector.broadcast %cst_60 : f32 to vector<8x1xf32>
    %97 = arith.divf %95, %96 : vector<8x1xf32>
    %98 = vector.broadcast %90 : vector<8x1xf32> to vector<8x32xf32>
    %99 = arith.subf %86, %98 : vector<8x32xf32>
    %cst_61 = arith.constant 9.99999974E-6 : f32
    %100 = vector.broadcast %cst_61 : f32 to vector<8x1xf32>
    %101 = arith.addf %97, %100 : vector<8x1xf32>
    %102 = math.rsqrt %101 : vector<8x1xf32>
    %103 = vector.broadcast %102 : vector<8x1xf32> to vector<8x32xf32>
    %104 = arith.mulf %99, %103 : vector<8x32xf32>
    %c0_62 = arith.constant 0 : index
    %c0_63 = arith.constant 0 : index
    %105 = vector.load %arg13[%c0_62, %c0_63] : memref<1x32xf32, #tpu.memory_space<vmem>>, vector<1x32xf32>
    %106 = vector.broadcast %105 : vector<1x32xf32> to vector<8x32xf32>
    %107 = arith.mulf %104, %106 : vector<8x32xf32>
    %c0_64 = arith.constant 0 : index
    %c0_65 = arith.constant 0 : index
    %108 = vector.load %arg14[%c0_64, %c0_65] : memref<1x32xf32, #tpu.memory_space<vmem>>, vector<1x32xf32>
    %109 = vector.broadcast %108 : vector<1x32xf32> to vector<8x32xf32>
    %110 = arith.addf %107, %109 : vector<8x32xf32>
    %c0_66 = arith.constant 0 : index
    %c0_67 = arith.constant 0 : index
    %111 = vector.load %arg9[%c0_66, %c0_67] : memref<32x64xf32, #tpu.memory_space<vmem>>, vector<32x64xf32>
    %cst_68 = arith.constant dense<0.000000e+00> : vector<8x64xf32>
    %112 = tpu.matmul %110, %111, %cst_68 {dimension_numbers = #tpu.dot_dimension_numbers<[1], [0], [0], [1], [0, 0, 1, 1], [], []>} : vector<8x32xf32>, vector<32x64xf32>, vector<8x64xf32> -> vector<8x64xf32>
    %c0_69 = arith.constant 0 : index
    %c0_70 = arith.constant 0 : index
    %113 = vector.load %arg10[%c0_69, %c0_70] : memref<1x64xf32, #tpu.memory_space<vmem>>, vector<1x64xf32>
    %114 = vector.broadcast %113 : vector<1x64xf32> to vector<8x64xf32>
    %115 = arith.addf %112, %114 : vector<8x64xf32>
    %cst_71 = arith.constant 0.000000e+00 : f32
    %116 = vector.broadcast %cst_71 : f32 to vector<8x64xf32>
    %117 = arith.maximumf %115, %116 : vector<8x64xf32>
    %c0_72 = arith.constant 0 : index
    %c0_73 = arith.constant 0 : index
    %118 = vector.load %arg11[%c0_72, %c0_73] : memref<64x32xf32, #tpu.memory_space<vmem>>, vector<64x32xf32>
    %cst_74 = arith.constant dense<0.000000e+00> : vector<8x32xf32>
    %119 = tpu.matmul %117, %118, %cst_74 {dimension_numbers = #tpu.dot_dimension_numbers<[1], [0], [0], [1], [0, 0, 1, 1], [], []>} : vector<8x64xf32>, vector<64x32xf32>, vector<8x32xf32> -> vector<8x32xf32>
    %c0_75 = arith.constant 0 : index
    %c0_76 = arith.constant 0 : index
    %120 = vector.load %arg12[%c0_75, %c0_76] : memref<1x32xf32, #tpu.memory_space<vmem>>, vector<1x32xf32>
    %121 = vector.broadcast %120 : vector<1x32xf32> to vector<8x32xf32>
    %122 = arith.addf %119, %121 : vector<8x32xf32>
    %123 = arith.addf %110, %122 : vector<8x32xf32>
    %cst_77 = arith.constant dense<0.000000e+00> : vector<8xf32>
    %124 = vector.multi_reduction <add>, %123, %cst_77 [1] : vector<8x32xf32> to vector<8xf32>
    %125 = vector.shape_cast %124 : vector<8xf32> to vector<8x1xf32>
    %cst_78 = arith.constant 3.200000e+01 : f32
    %126 = vector.broadcast %cst_78 : f32 to vector<8x1xf32>
    %127 = arith.divf %125, %126 : vector<8x1xf32>
    %128 = vector.broadcast %127 : vector<8x1xf32> to vector<8x32xf32>
    %129 = arith.subf %123, %128 : vector<8x32xf32>
    %130 = arith.mulf %129, %129 : vector<8x32xf32>
    %cst_79 = arith.constant dense<0.000000e+00> : vector<8xf32>
    %131 = vector.multi_reduction <add>, %130, %cst_79 [1] : vector<8x32xf32> to vector<8xf32>
    %132 = vector.shape_cast %131 : vector<8xf32> to vector<8x1xf32>
    %cst_80 = arith.constant 3.200000e+01 : f32
    %133 = vector.broadcast %cst_80 : f32 to vector<8x1xf32>
    %134 = arith.divf %132, %133 : vector<8x1xf32>
    %135 = vector.broadcast %127 : vector<8x1xf32> to vector<8x32xf32>
    %136 = arith.subf %123, %135 : vector<8x32xf32>
    %cst_81 = arith.constant 9.99999974E-6 : f32
    %137 = vector.broadcast %cst_81 : f32 to vector<8x1xf32>
    %138 = arith.addf %134, %137 : vector<8x1xf32>
    %139 = math.rsqrt %138 : vector<8x1xf32>
    %140 = vector.broadcast %139 : vector<8x1xf32> to vector<8x32xf32>
    %141 = arith.mulf %136, %140 : vector<8x32xf32>
    %c0_82 = arith.constant 0 : index
    %c0_83 = arith.constant 0 : index
    %142 = vector.load %arg15[%c0_82, %c0_83] : memref<1x32xf32, #tpu.memory_space<vmem>>, vector<1x32xf32>
    %143 = vector.broadcast %142 : vector<1x32xf32> to vector<8x32xf32>
    %144 = arith.mulf %141, %143 : vector<8x32xf32>
    %c0_84 = arith.constant 0 : index
    %c0_85 = arith.constant 0 : index
    %145 = vector.load %arg16[%c0_84, %c0_85] : memref<1x32xf32, #tpu.memory_space<vmem>>, vector<1x32xf32>
    %146 = vector.broadcast %145 : vector<1x32xf32> to vector<8x32xf32>
    %147 = arith.addf %144, %146 : vector<8x32xf32>
    %c0_86 = arith.constant 0 : index
    %c0_87 = arith.constant 0 : index
    %c0_88 = arith.constant 0 : index
    %148 = vector.load %arg17[%c0_86, %c0_87, %c0_88] : memref<1x8x32xf32, #tpu.memory_space<vmem>>, vector<1x8x32xf32>
    %149 = vector.shape_cast %148 : vector<1x8x32xf32> to vector<8x32xf32>
    %150 = vector.shape_cast %147 : vector<8x32xf32> to vector<1x8x32xf32>
    tpu.vector_store %arg17[%c0_86, %c0_87, %c0_88], %150 {strides = array<i32>} : memref<1x8x32xf32, #tpu.memory_space<vmem>>, vector<1x8x32xf32>,
    return
  }
  func.func @transform_0(%arg0: i32, %arg1: i32) -> (i32, i32, i32) {
    %c0_i32 = arith.constant 0 : i32
    %c0_i32_0 = arith.constant 0 : i32
    %c0_i32_1 = arith.constant 0 : i32
    return %arg0, %c0_i32, %c0_i32_0 : i32, i32, i32
  }
  func.func @transform_1(%arg0: i32, %arg1: i32) -> (i32, i32) {
    %c0_i32 = arith.constant 0 : i32
    %c0_i32_0 = arith.constant 0 : i32
    %c0_i32_1 = arith.constant 0 : i32
    return %c0_i32, %c0_i32_0 : i32, i32
  }
  func.func @transform_2(%arg0: i32, %arg1: i32) -> (i32, i32) {
    %c0_i32 = arith.constant 0 : i32
    %c0_i32_0 = arith.constant 0 : i32
    %c0_i32_1 = arith.constant 0 : i32
    return %c0_i32, %c0_i32_0 : i32, i32
  }
  func.func @transform_3(%arg0: i32, %arg1: i32) -> (i32, i32) {
    %c0_i32 = arith.constant 0 : i32
    %c0_i32_0 = arith.constant 0 : i32
    %c0_i32_1 = arith.constant 0 : i32
    return %c0_i32, %c0_i32_0 : i32, i32
  }
  func.func @transform_4(%arg0: i32, %arg1: i32) -> (i32, i32) {
    %c0_i32 = arith.constant 0 : i32
    %c0_i32_0 = arith.constant 0 : i32
    %c0_i32_1 = arith.constant 0 : i32
    return %c0_i32, %c0_i32_0 : i32, i32
  }
  func.func @transform_5(%arg0: i32, %arg1: i32) -> (i32, i32) {
    %c0_i32 = arith.constant 0 : i32
    %c0_i32_0 = arith.constant 0 : i32
    %c0_i32_1 = arith.constant 0 : i32
    return %c0_i32, %c0_i32_0 : i32, i32
  }
  func.func @transform_6(%arg0: i32, %arg1: i32) -> (i32, i32) {
    %c0_i32 = arith.constant 0 : i32
    %c0_i32_0 = arith.constant 0 : i32
    %c0_i32_1 = arith.constant 0 : i32
    return %c0_i32, %c0_i32_0 : i32, i32
  }
  func.func @transform_7(%arg0: i32, %arg1: i32) -> (i32, i32) {
    %c0_i32 = arith.constant 0 : i32
    %c0_i32_0 = arith.constant 0 : i32
    %c0_i32_1 = arith.constant 0 : i32
    return %c0_i32, %c0_i32_0 : i32, i32
  }
  func.func @transform_8(%arg0: i32, %arg1: i32) -> (i32, i32) {
    %c0_i32 = arith.constant 0 : i32
    %c0_i32_0 = arith.constant 0 : i32
    %c0_i32_1 = arith.constant 0 : i32
    return %c0_i32, %c0_i32_0 : i32, i32
  }
  func.func @transform_9(%arg0: i32, %arg1: i32) -> (i32, i32) {
    %c0_i32 = arith.constant 0 : i32
    %c0_i32_0 = arith.constant 0 : i32
    %c0_i32_1 = arith.constant 0 : i32
    return %c0_i32, %c0_i32_0 : i32, i32
  }
  func.func @transform_10(%arg0: i32, %arg1: i32) -> (i32, i32) {
    %c0_i32 = arith.constant 0 : i32
    %c0_i32_0 = arith.constant 0 : i32
    %c0_i32_1 = arith.constant 0 : i32
    return %c0_i32, %c0_i32_0 : i32, i32
  }
  func.func @transform_11(%arg0: i32, %arg1: i32) -> (i32, i32) {
    %c0_i32 = arith.constant 0 : i32
    %c0_i32_0 = arith.constant 0 : i32
    %c0_i32_1 = arith.constant 0 : i32
    return %c0_i32, %c0_i32_0 : i32, i32
  }
  func.func @transform_12(%arg0: i32, %arg1: i32) -> (i32, i32) {
    %c0_i32 = arith.constant 0 : i32
    %c0_i32_0 = arith.constant 0 : i32
    %c0_i32_1 = arith.constant 0 : i32
    return %c0_i32, %c0_i32_0 : i32, i32
  }
  func.func @transform_13(%arg0: i32, %arg1: i32) -> (i32, i32) {
    %c0_i32 = arith.constant 0 : i32
    %c0_i32_0 = arith.constant 0 : i32
    %c0_i32_1 = arith.constant 0 : i32
    return %c0_i32, %c0_i32_0 : i32, i32
  }
  func.func @transform_14(%arg0: i32, %arg1: i32) -> (i32, i32) {
    %c0_i32 = arith.constant 0 : i32
    %c0_i32_0 = arith.constant 0 : i32
    %c0_i32_1 = arith.constant 0 : i32
    return %c0_i32, %c0_i32_0 : i32, i32
  }
  func.func @transform_15(%arg0: i32, %arg1: i32) -> (i32, i32, i32) {
    %c0_i32 = arith.constant 0 : i32
    %c0_i32_0 = arith.constant 0 : i32
    return %arg0, %arg1, %c0_i32 : i32, i32, i32
  }
}

</mosaic_0001>

<bundles_post_ra>
// kernel: tpu_custom_call.1
= control target key start
LH: loop header
LB: loop body
LE: loop exit
PB: predicated region body
PF: predicated region fallthrough
CT: control target
= control target key end

     0   :  { %s2737_s0 = inlined_call_operand.hbm [shape: f32[2,8,32], index: 0, kind: input, shape index: {}]   ;;  %s2738_s1 = inlined_call_operand.vmem [shape: f32[32,32], index: 1, kind: input, shape index: {}]   ;;  %s2739_s2 = inlined_call_operand.vmem [shape: f32[1,32], index: 2, kind: input, shape index: {}]   ;;  %s2740_s3 = inlined_call_operand.vmem [shape: f32[32,64], index: 3, kind: input, shape index: {}]   ;;  %s2741_s4 = inlined_call_operand.vmem [shape: f32[1,64], index: 4, kind: input, shape index: {}]   ;;  %s2742_s5 = inlined_call_operand.vmem [shape: f32[32,32], index: 5, kind: input, shape index: {}]   ;;  %s2743_s6 = inlined_call_operand.vmem [shape: f32[1,32], index: 6, kind: input, shape index: {}]   ;;  %s2744_s7 = inlined_call_operand.hbm [shape: f32[32,64], index: 7, kind: input, shape index: {}]   ;;  %s2745_s8 = inlined_call_operand.vmem [shape: f32[1,64], index: 8, kind: input, shape index: {}]   ;;  %s2746_s9 = inlined_call_operand.vmem [shape: f32[64,32], index: 9, kind: input, shape index: {}]   ;;  %s2747_s10 = inlined_call_operand.vmem [shape: f32[1,32], index: 10, kind: input, shape index: {}]   ;;  %s2748_s11 = inlined_call_operand.vmem [shape: f32[1,32], index: 11, kind: input, shape index: {}]   ;;  %s2749_s12 = inlined_call_operand.vmem [shape: f32[1,32], index: 12, kind: input, shape index: {}]   ;;  %s2750_s13 = inlined_call_operand.vmem [shape: f32[1,32], index: 13, kind: input, shape index: {}]   ;;  %s2751_s14 = inlined_call_operand.vmem [shape: f32[1,32], index: 14, kind: input, shape index: {}]   ;;  %s2752_s15 = inlined_call_operand.hbm [shape: f32[2,8,32], index: 15, kind: output, shape index: {}]  }
   0x1   :  { %2759 = sst [smem:[#allocation19_spill]] %s2744_s7 }
   0x2   :  { %2760 = sst [smem:[#allocation20_spill]] %s2745_s8 }
   0x3   :  { %2761 = sst [smem:[#allocation21_spill]] %s2747_s10 }
   0x4   :  { %2762 = sst [smem:[#allocation22_spill]] %s2749_s12 }
   0x5   :  { %2763 = sst [smem:[#allocation23_spill]] %s2750_s13 }
   0x6   :  { %2764 = sst [smem:[#allocation24_spill]] %s2751_s14 }
   0x7   :  { %2765 = sst [smem:[#allocation25_spill]] %s2752_s15 }
   0x8   :  { %20 = vsyncpa [#allocation6], 0 }
   0x9   :  { %22 = vsyncpa [#allocation6 + $0x1], 0 }
   0xa   :  { %23 = vsyncpa [#allocation9], 0 }
   0xb   :  { %24 = vsyncpa [#allocation7], 0 }
   0xc   :  { %26 = vsyncpa [#allocation7 + $0x1], 0  ;;  %s2373_s18 = smov 0   ;;  %s2375_s19 = smov 0  }
   0xd   :  { %s2377_s20 = smov 0   ;;  %s2379_s21 = smov 0  }
   0xe   :  { %s2381_s22 = smov 0   ;;  %s2383_s23 = smov 0  }
   0xf LB: > { %2766 = sst [smem:[#allocation14_spill]] %s2254_s18  ;;  %s1840_s24 = sadd.s32 4294967295, %s2274_s23   ;;  %s2274_s23 = sphi %s2383_s23, %s32_s23   ;;  %s2270_s22 = sphi %s2381_s22, %s2795_s22   ;;  %s2266_s21 = sphi %s2379_s21, %s2794_s21   ;;  %s2262_s20 = sphi %s2377_s20, %s2798_s20   ;;  %s2258_s19 = sphi %s2375_s19, %s2797_s19   ;;  %s2254_s18 = sphi %s2373_s18, %s2796_s18  }
  0x10   : > { %2767 = sst [smem:[#allocation15_spill]] %s2266_s21  ;;  %s1841_s25 = sadd.s32 4294967294, %s2274_s23  }
  0x11   : > { %2768 = sst [smem:[#allocation16_spill]] %s2270_s22  ;;  %p64_p0 = scmp.ne.s32.totalorder %s2258_s19, %s2254_s18 }
  0x12   : > { %p2407_p1 = scmp.eq.s32.totalorder %s1840_s24, 0  ;;  %p2411_p2 = scmp.eq.s32.totalorder %s1840_s24, 1 }
  0x13   : > { %p390_p3 = scmp.eq.s32.totalorder %s1841_s25, 1  ;;  %p1842_p5 = scmp.ge.s32.totalorder %s2274_s23, 1 }
  0x14   : > { %p2417_p4 = por %p2407_p1, %p64_p0  ;;  %p397_p7 = scmp.lt.s32.totalorder %s2274_s23, 3 }
  0x15   : > { %p2422_p6 = por %p390_p3, %p64_p0  ;;  %s2276_s16 = smov [#allocation8]  }
  0x16   : > { %s2771_s28 = scalar_select %p2417_p4, 1, 0 }
  0x17   : > { %s2772_s29 = scalar_select %p2422_p6, 1, 0 }
  0x18   : > { %p2427_p8 = pnand %p1842_p5, %p397_p7  ;;  %s427_s17 = sshll.u32 %s2276_s16, 4  ;;  %s428_s17 = int_to_ptr.vmem [resolvable:$true] %s427_s17 }
  0x19   : > { %2773 = sst [smem:[#allocation17_spill]] %s2772_s29  ;;  %s44_s25 = sadd.s32 1, %s2270_s22 }
  0x1a   : > { %p2037_p9 = pneg %p2427_p8  ;;  %s2147_s29 = scalar_lea.vmem %s428_s17, 512 }
  0x1b   : > { %p2148_p13 = scmp.ne.s32.totalorder %s428_s17, %s2147_s29  ;;  %p2155_p5 = scmp.lt.s32.totalorder %s428_s17, %s428_s17 }
  0x1c   : > { %p2436_p11 = pnand %p2037_p9, %p2407_p1  ;;  %p2156_p7 = scmp.lt.s32.totalorder %s2147_s29, %s2147_s29 }
  0x1e   : > { %p2138_p12 = pneg %p2436_p11  ;;  %p2157_p6 = por %p2156_p7, %p2155_p5 }
  0x20   : > { %p2150_p0 = pnand %p2148_p13, %p2138_p12 }
  0x22   : > { %p2151_p3 = pneg %p2150_p0 }
  0x24   : > { %p2158_p4 = pnand %p2157_p6, %p2151_p3 }
  0x26   : > { %2161 = shalt.err (!%p2158_p4)
}
  0x27   : > { %s2277_s16 = smov 128   ;;  %s2278_s18 = smov 8  }
  0x28   : > { %s2776_s7 = sld [smem:[#allocation19_spill]]  ;;  %p46_p6 = scmp.ge.s32.totalorder %s44_s25, 2 }
  0x29   : > { %s51_s29 = sadd.s32 1, %s2262_s20  ;;  %p58_p4 = scmp.ne.s32.totalorder %s2262_s20, %s2258_s19 }
  0x2a   : > { %p59_p9 = scmp.eq.s32.totalorder %s2274_s23, 0  ;;  %s2800_s25 = smov (%p46_p6, %s44_s25), 0 }
  0x2b   : > { %2777 = sst [smem:[#allocation18_spill]] %s2800_s25  ;;  %p2460_p13 = por %p2411_p2, %p58_p4 }
  0x2c   : > { %p2454_p12 = por %p59_p9, %p58_p4  ;;  %s48_s24 = ssub.s32 %s2270_s22, %s2800_s25 }
  0x2d   : > { %p2050_p0 = scmp.lt.s32.totalorder %s2274_s23, 2  ;;  %s462_s14 = sand.u32 1, %s2262_s20  }
  0x2e   : > { %2040 = dma.hbm_to_vmem [thread:$0]  (!%p2436_p11), %s2776_s7, 512, %s428_s17, [#allocation9], %s2277_s16, %s2277_s16, %s2278_s18  }
  0x2f   : > { %p49_p11 = scmp.eq.s32.totalorder %s48_s24, 0  ;;  %s1845_s15 = sshll.u32 %s462_s14, 3 }
  0x30   : > { %s1846_s17 = sshll.u32 %s2270_s22, 7  ;;  %s466_s8 = scalar_lea.vmem [#allocation5], %s1845_s15 }
  0x31   : > { %s2469_s18 = scalar_select %p49_p11, %s2262_s20, %s51_s29  }
  0x32   : > { %s471_s10 = scalar_lea.hbm %s2737_s0, %s1846_s17  ;;  %s473_s12 = sshll.u32 %s466_s8, 4  ;;  %s474_s12 = int_to_ptr.vmem [resolvable:$true] %s473_s12 }
  0x33   : > { %p2477_p2 = pnand %p2050_p0, %p2454_p12  ;;  %s463_s25 = scalar_lea.sflag [#allocation6], %s462_s14 }
  0x34   : > { %s2175_s24 = scalar_lea.vmem %s474_s12, 128  ;;  %s2279_s29 = smov [#allocation5]  }
  0x35   : > { %p2164_p3 = pneg %p2477_p2  ;;  %p2176_p5 = scmp.ne.s32.totalorder %s474_s12, %s2175_s24 }
  0x36   : > { %s2180_s22 = sshll.u32 %s2279_s29, 4  ;;  %s2181_s22 = int_to_ptr.vmem [resolvable:$false] %s2180_s22 }
  0x37   : > { %p2178_p7 = pnand %p2176_p5, %p2164_p3  ;;  %s2182_s7 = scalar_lea.vmem %s2181_s22, 256 }
  0x38   : > { %p2183_p4 = scmp.lt.s32.totalorder %s474_s12, %s2181_s22  ;;  %p2184_p9 = scmp.lt.s32.totalorder %s2182_s7, %s2175_s24 }
  0x39   : > { %p2179_p6 = pneg %p2178_p7 }
  0x3a   : > { %p2185_p11 = por %p2184_p9, %p2183_p4 }
  0x3c   : > { %p2186_p10 = pnand %p2185_p11, %p2179_p6 }
  0x3e   : > { %2189 = shalt.err (!%p2186_p10)
}
  0x3f   : > { %2044 = dma.hbm_to_vmem [thread:$0]  (!%p2477_p2), %s471_s10, 128, %s474_s12, %s463_s25  }
  0x40   : > { %482 = sbr.rel (%p2427_p8) target bundleno = 2306 (0x902), region = 80  ;;  %s2488_s8 = sand.u32 (!%p2427_p8), 1, %s2258_s19  }
  0x41   : > { %s1848_s13 = sshll.u32 (!%p2427_p8), %s2488_s8, 3  ;;  %s485_s14 = scalar_lea.sflag (!%p2427_p8), [#allocation6], %s2488_s8 }
  0x42   : > { %s488_s22 = scalar_lea.vmem (!%p2427_p8), [#allocation5], %s1848_s13  ;;  %p2781_p12 = scmp.ne.s32.totalorder (!%p2427_p8), %s2771_s28, 0 }
  0x45   : > { %2241 = dma.done.wait (%p2781_p12), %s485_s14, 128  }
  0x46   : > { %2243 = vsyncadd (%p2781_p12), %s485_s14, 4294967168 }
  0x47   : > { %2245 = dma.done.wait (%p2407_p1), [#allocation9], 512  }
  0x48   : > { %2247 = vsyncadd (%p2407_p1), [#allocation9], 4294966784  ;;  %v2280_v0 = vmov 0.0   ;;  %vm2281_vm0 = vmmov 0   ;;  %v547_v1 = vld [vmem:[%s2740_s3 + $0x18] sm:$0xff]  ;;  %v546_v2 = vld [vmem:[%s2740_s3 + $0x10] sm:$0xff] }
  0x49   : > { %1926 = vmatprep.subr.mxu1 %v2280_v0  ;;  %1934 = vmatprep.mubr.msk.f32.mxu1 %vm2281_vm0, %v2280_v0  ;;  %v545_v3 = vld [vmem:[%s2740_s3 + $0x8] sm:$0xff]  ;;  %v544_v4 = vld [vmem:[%s2740_s3] sm:$0xff]  ;;  %vm555_vm1 = vcmask 261120   ;;  %v637_v6 = vld [vmem:[%s2738_s1 + $0x18] sm:$0xff]  ;;  %vm629_vm2 = vcmask 523264   ;;  %vm723_vm3 = vcmask 64512  }
  0x4a   : > { %1948 = vmatprep.subr.mxu0 %v2280_v0  ;;  %1950 = vmatprep.mubr.msk.f32.mxu0 %vm2281_vm0, %v2280_v0  ;;  %v2522_v5 = vld [vmem:[%s488_s22] sm:$0xff]  ;;  %v636_v7 = vld [vmem:[%s2738_s1 + $0x10] sm:$0xff]  ;;  %v635_v8 = vld [vmem:[%s2738_s1 + $0x8] sm:$0xff]  ;;  %s2282_s25 = smov 112   ;;  %s2283_s15 = smov 120   ;;  %vm1061_vm4 = vcmask 130112  }
  0x4b   : > { %1927 = vmatpush3.msra.mxu1 %v547_v1  ;;  %v634_v9 = vld [vmem:[%s2738_s1] sm:$0xff]  ;;  %s2284_s17 = smov 104   ;;  %s2285_s16 = smov 96   ;;  %vm1236_vm5 = vcmask 195712   ;;  %vm1411_vm6 = vcmask 261312  }
  0x4c   : > { %1928 = vmatprep.subr.mxu1 %v2280_v0  ;;  %v1851_v10 = vld [vmem:[%s2741_s4] ss:$0 sm:$0xff]  ;;  %s2286_s27 = smov 80   ;;  %s2287_s24 = smov 72  }
  0x4d   : > { %1929 = vmatpush3.msra.mxu1 %v546_v2  ;;  %v1853_v14 = vld [vmem:[%s2739_s2] ss:$0 sm:$0xff]  ;;  %s2288_s29 = smov 88   ;;  %s2783_s30 = sld [smem:[#allocation20_spill]] }
  0x4e   : > { %1930 = vmatprep.subr.mxu1 %v2280_v0  ;;  %s2787_s14 = sld [smem:[#allocation24_spill]]  ;;  %s538_s10 = scalar_lea.vmem [#allocation10], %s1848_s13 }
  0x4f   : > { %1931 = vmatpush3.msra.mxu1 %v545_v3  ;;  %s1749_s12 = sshll.u32 %s538_s10, 4  ;;  %s2788_s26 = sld [smem:[#allocation25_spill]]  ;;  %s1750_s12 = int_to_ptr.vmem [resolvable:$true] %s1749_s12 }
  0x50   : > { %1932 = vmatprep.subr.mxu1 %v2280_v0 }
  0x51   : > { %1933 = vmatpush3.msra.mxu1 %v544_v4 }
  0x52   : > { %1935 = vmatmul.mubr.msk.f32.vlgmr.msra.gmra.mxu1 %vm555_vm1, %v2522_v5  ;;  %1937 = vmatprep.subr.mxu1 %v2280_v0 }
  0x53   : > { %1938 = vmatpush3.msra.mxu1 %v637_v6  ;;  %1945 = vmatprep.mubr.msk.f32.mxu1 %vm2281_vm0, %v2280_v0 }
  0x54   : > { %1939 = vmatprep.subr.mxu1 %v2280_v0 }
  0x55   : > { %1940 = vmatpush3.msra.mxu1 %v636_v7 }
  0x56   : > { %1941 = vmatprep.subr.mxu1 %v2280_v0 }
  0x57   : > { %1942 = vmatpush3.msra.mxu1 %v635_v8 }
  0x58   : > { %1943 = vmatprep.subr.mxu1 %v2280_v0 }
  0x59   : > { %1944 = vmatpush3.msra.mxu1 %v634_v9  ;;  %v1417_v9 = vld [vmem:[%s2742_s5 + $0x18] sm:$0xff] }
  0x5a   : > { %1946 = vmatmul.mubr.msk.f32.vlgmr.msra.gmra.mxu1 %vm555_vm1, %v2522_v5  ;;  %1953 = vmatprep.subr.mxu1 %v2280_v0 }
  0x5b   : > { %1955 = vmatprep.mubr.msk.f32.mxu1 %vm2281_vm0, %v2280_v0 }
 0x112   : > { %v625_v11 = vpop.f32.mrf.mxu1 }
 0x113   : > { %v626_v12 = vadd.f32 %v1851_v10, %v625_v11  ;;  %v1416_v10 = vld [vmem:[%s2742_s5 + $0x10] sm:$0xff] }
 0x114   : > { %v1936_v13 = vpop.f32.mrf.mxu1 }
 0x115   : > { %630 = vst.msk [vmem:[#allocation2] sm:$0xff] %vm629_vm2, %v626_v12  ;;  %v1415_v13 = vld [vmem:[%s2742_s5 + $0x8] sm:$0xff] }
 0x11a   : > { %v715_v15 = vpop.f32.mrf.mxu1 }
 0x11b   : > { %v716_v16 = vadd.f32 %v1853_v14, %v715_v15 }
 0x11c   : > { %v1947_v17 = vpop.f32.mrf.mxu1  ;;  %v2557_v18 = vld [vmem:[#allocation2] sm:$0xff] }
 0x11d   : > { %v719_v19 = vmul.f32 0.35355338, %v716_v16  ;;  %1069 = vrot.lane.b32.xlu1 %v2557_v18, %s2282_s25  ;;  %894 = vrot.lane.b32.xlu0 %v2557_v18, %s2283_s15  ;;  %v1414_v16 = vld [vmem:[%s2742_s5] sm:$0xff] }
 0x11e   : > { %1949 = vmatpush3.xpose.msk.msra.mxu0 %vm723_vm3, %v2557_v18 }
 0x11f   : > { %720 = vst.msk [vmem:[#allocation3] sm:$0xff] %vm555_vm1, %v719_v19  ;;  %1958 = vmatprep.subr.mxu0 %v2280_v0 }
 0x126   : > { %v1063_v20 = vld [vmem:[#allocation3] sm:$0xff] }
 0x127   : > { %1066 = vrot.lane.b32.xlu1 %v1063_v20, %s2282_s25  ;;  %891 = vrot.lane.b32.xlu0 %v1063_v20, %s2283_s15  ;;  %s2289_s25 = smov 8   ;;  %s2290_s15 = smov 16  }
 0x128   : > { %1951 = vmatmul.mubr.msk.f32.vlgmr.msra.gmra.mxu0 %vm723_vm3, %v1063_v20 }
 0x129   : > { %1960 = vmatprep.mubr.msk.f32.mxu0 %vm2281_vm0, %v2280_v0 }
 0x12b   : > { %1241 = vrot.lane.b32.xlu1 %v1063_v20, %s2284_s17  ;;  %1244 = vrot.lane.b32.xlu0 %v2557_v18, %s2284_s17  ;;  %s2291_s17 = smov 24  }
 0x12f   : > { %809 = vrot.lane.b32.xlu1 %v2557_v18, %s2285_s16  ;;  %s2190_s16 = scalar_lea.vmem %s1750_s12, 128 }
 0x130   : > { %p2191_p1 = scmp.ne.s32.totalorder %s1750_s12, %s2190_s16 }
 0x132   : > { %p2192_p8 = pnand %p2191_p1, %p2460_p13 }
 0x134   : > { %p2193_p10 = pneg %p2192_p8 }
 0x18f   : > { %v895_v21 = vpop.permute.xlu0 %894  ;;  %v1070_v22 = vpop.permute.xlu1 %1069 }
 0x190   : > { %1959 = vmatpush3.xpose.msk.msra.mxu0 %vm723_vm3, %v895_v21 }
 0x191   : > { %1968 = vmatprep.subr.mxu0 %v2280_v0 }
 0x199   : > { %v1067_v23 = vpop.permute.xlu1 %1066  ;;  %v892_v24 = vpop.permute.xlu0 %891 }
 0x19a   : > { %1961 = vmatmul.mubr.msk.f32.vlgmr.msra.gmra.mxu0 %vm723_vm3, %v892_v24 }
 0x19b   : > { %1969 = vmatpush3.xpose.msk.msra.mxu0 %vm723_vm3, %v1070_v22  ;;  %1970 = vmatprep.mubr.msk.f32.mxu0 %vm2281_vm0, %v2280_v0 }
 0x19c   : > { %1978 = vmatprep.subr.mxu0 %v2280_v0 }
 0x19d   : > { %v1242_v25 = vpop.permute.xlu1 %1241  ;;  %v1245_v26 = vpop.permute.xlu0 %1244 }
 0x19e   : > { %1971 = vmatmul.mubr.msk.f32.vlgmr.msra.gmra.mxu0 %vm723_vm3, %v1067_v23 }
 0x19f   : > { %1979 = vmatpush3.xpose.msk.msra.mxu0 %vm723_vm3, %v1245_v26  ;;  %1980 = vmatprep.mubr.msk.f32.mxu0 %vm2281_vm0, %v2280_v0 }
 0x1a0   : > { %1988 = vmatprep.subr.mxu0 %v2280_v0 }
 0x1a1   : > { %v810_v27 = vpop.permute.xlu1 %809 }
 0x1a2   : > { %1954 = vmatpush3.msra.mxu1 %v810_v27  ;;  %1981 = vmatmul.mubr.msk.f32.vlgmr.msra.gmra.mxu0 %vm723_vm3, %v1242_v25 }
 0x1a3   : > { %1963 = vmatprep.subr.mxu1 %v2280_v0  ;;  %1996 = vmatprep.mubr.msk.f32.mxu0 %vm2281_vm0, %v2280_v0 }
 0x1a4   : > { %1989 = vmatpush3.msra.mxu0 %v1417_v9 }
 0x1a5   : > { %1990 = vmatprep.subr.mxu0 %v2280_v0 }
 0x1a6   : > { %1991 = vmatpush3.msra.mxu0 %v1416_v10 }
 0x1a7   : > { %1992 = vmatprep.subr.mxu0 %v2280_v0 }
 0x1a8   : > { %1993 = vmatpush3.msra.mxu0 %v1415_v13 }
 0x1a9   : > { %1994 = vmatprep.subr.mxu0 %v2280_v0 }
 0x1aa   : > { %1995 = vmatpush3.msra.mxu0 %v1414_v16 }
 0x1ab   : > { %2010 = vmatprep.subr.mxu0 %v2280_v0 }
 0x1e8   : > { %v796_v28 = vpop.f32.mrf.mxu0 }
 0x1e9   : > { %v800_v29 = vsel %vm723_vm3, %v796_v28, -inf }
 0x1ea   : > { %801 = vmax.xlane.f32.xlu0 %v800_v29  ;;  %v1952_v30 = vpop.f32.mrf.mxu0  ;;  %v1867_v29 = vld [vmem:[%s2743_s6] ss:$0 sm:$0xff] }
 0x25a   : > { %v966_v31 = vpop.f32.mrf.mxu0 }
 0x25b   : > { %v970_v32 = vsel %vm723_vm3, %v966_v31, -inf }
 0x25c   : > { %971 = vmax.xlane.f32.xlu1 %v970_v32  ;;  %v1962_v33 = vpop.f32.mrf.mxu0 }
 0x25e   : > { %v1141_v34 = vpop.f32.mrf.mxu0 }
 0x25f   : > { %v1145_v35 = vsel %vm723_vm3, %v1141_v34, -inf }
 0x260   : > { %1146 = vmax.xlane.f32.xlu0 %v1145_v35  ;;  %v1972_v36 = vpop.f32.mrf.mxu0 }
 0x262   : > { %v1316_v37 = vpop.f32.mrf.mxu0 }
 0x263   : > { %v1320_v38 = vsel %vm723_vm3, %v1316_v37, -inf }
 0x264   : > { %1321 = vmax.xlane.f32.xlu0 %v1320_v38  ;;  %v1982_v39 = vpop.f32.mrf.mxu0 }
 0x26d   : > { %1154 = vrot.lane.b32.xlu1 %v2557_v18, %s2286_s27  ;;  %s2782_s27 = sld [smem:[#allocation22_spill]] }
 0x271   : > { %1329 = vrot.lane.b32.xlu1 %v2557_v18, %s2287_s24  ;;  %s2786_s24 = sld [smem:[#allocation23_spill]] }
 0x273   : > { %v802_v40 = vpop.xlane.xlu0 %801 }
 0x274   : > { %v803_v41 = vsub.f32 %v796_v28, %v802_v40  ;;  %v1532_v40 = vld [vmem:[#allocation8 + $0x18] sm:$0xff] }
 0x276   : > { %v804_v42 = vmul.f32 1.442695, %v803_v41  ;;  %v1531_v41 = vld [vmem:[#allocation8 + $0x10] sm:$0xff] }
 0x278   : > { %2116 = vpow2.f32 %v804_v42  ;;  %v1530_v42 = vld [vmem:[#allocation8 + $0x8] sm:$0xff] }
 0x27a   : > { %979 = vrot.lane.b32.xlu0 %v2557_v18, %s2288_s29 }
 0x285   : > { %v2117_v43 = vpop.eup %2116 }
 0x286   : > { %1956 = vmatmul.mubr.msk.f32.vlgmr.msra.gmra.mxu1 %vm723_vm3, %v2117_v43  ;;  %v806_v62 = vsel %vm723_vm3, %v2117_v43, 0.0  ;;  %v1621_v43 = vld [vmem:[%s2746_s9 + $0x38] sm:$0xff] }
 0x287   : > { %1965 = vmatprep.mubr.msk.f32.mxu1 %vm2281_vm0, %v2280_v0 }
 0x2e5   : > { %v972_v44 = vpop.xlane.xlu1 %971 }
 0x2e6   : > { %v973_v45 = vsub.f32 %v966_v31, %v972_v44  ;;  %v1620_v44 = vld [vmem:[%s2746_s9 + $0x30] sm:$0xff] }
 0x2e8   : > { %v974_v46 = vmul.f32 1.442695, %v973_v45  ;;  %v1619_v45 = vld [vmem:[%s2746_s9 + $0x28] sm:$0xff] }
 0x2e9   : > { %v1147_v47 = vpop.xlane.xlu0 %1146  ;;  %v1155_v54 = vpop.permute.xlu1 %1154 }
 0x2ea   : > { %2118 = vpow2.f32 %v974_v46  ;;  %v1148_v48 = vsub.f32 %v1141_v34, %v1147_v47  ;;  %v1618_v46 = vld [vmem:[%s2746_s9 + $0x20] sm:$0xff]  ;;  %v1617_v47 = vld [vmem:[%s2746_s9 + $0x18] sm:$0xff] }
 0x2ec   : > { %v1149_v49 = vmul.f32 1.442695, %v1148_v48 }
 0x2ed   : > { %v1322_v50 = vpop.xlane.xlu0 %1321  ;;  %v1330_v58 = vpop.permute.xlu1 %1329 }
 0x2ee   : > { %2120 = vpow2.f32 %v1149_v49  ;;  %v1323_v51 = vsub.f32 %v1316_v37, %v1322_v50 }
 0x2f0   : > { %v1324_v52 = vmul.f32 1.442695, %v1323_v51 }
 0x2f1   : > { %v980_v53 = vpop.permute.xlu0 %979 }
 0x2f2   : > { %2122 = vpow2.f32 %v1324_v52  ;;  %1964 = vmatpush3.msra.mxu1 %v980_v53  ;;  %v1869_v52 = vld [vmem:[%s2748_s11] ss:$0 sm:$0xff] }
 0x2f3   : > { %1973 = vmatprep.subr.mxu1 %v2280_v0 }
 0x2f7   : > { %v2119_v55 = vpop.eup %2118 }
 0x2f8   : > { %1966 = vmatmul.mubr.msk.f32.vlgmr.msra.gmra.mxu1 %vm723_vm3, %v2119_v55  ;;  %v976_v56 = vsel %vm723_vm3, %v2119_v55, 0.0 }
 0x2f9   : > { %1974 = vmatpush3.msra.mxu1 %v1155_v54  ;;  %977 = vadd.xlane.f32.xlu0 %v976_v56  ;;  %v1870_v54 = vld [vmem:[%s2782_s27] ss:$0 sm:$0xff]  ;;  %s2292_s27 = smov [#allocation10]  }
 0x2fa   : > { %1975 = vmatprep.mubr.msk.f32.mxu1 %vm2281_vm0, %v2280_v0  ;;  %1983 = vmatprep.subr.mxu1 %v2280_v0 }
 0x2fb   : > { %v2121_v57 = vpop.eup %2120 }
 0x2fc   : > { %1976 = vmatmul.mubr.msk.f32.vlgmr.msra.gmra.mxu1 %vm723_vm3, %v2121_v57  ;;  %v1151_v59 = vsel %vm723_vm3, %v2121_v57, 0.0  ;;  %v1616_v57 = vld [vmem:[%s2746_s9 + $0x10] sm:$0xff] }
 0x2fd   : > { %1984 = vmatpush3.msra.mxu1 %v1330_v58  ;;  %1152 = vadd.xlane.f32.xlu1 %v1151_v59  ;;  %v1615_v58 = vld [vmem:[%s2746_s9 + $0x8] sm:$0xff]  ;;  %v1614_v59 = vld [vmem:[%s2746_s9] sm:$0xff] }
 0x2fe   : > { %1985 = vmatprep.mubr.msk.f32.mxu1 %vm2281_vm0, %v2280_v0  ;;  %1999 = vmatprep.subr.mxu1 %v2280_v0 }
 0x2ff   : > { %v2123_v60 = vpop.eup %2122 }
 0x300   : > { %1986 = vmatmul.mubr.msk.f32.vlgmr.msra.gmra.mxu1 %vm723_vm3, %v2123_v60  ;;  %v1326_v61 = vsel %vm723_vm3, %v2123_v60, 0.0  ;;  %v1871_v60 = vld [vmem:[%s2783_s30] ss:$0 sm:$0xff] }
 0x301   : > { %1327 = vadd.xlane.f32.xlu0 %v1326_v61  ;;  %2007 = vmatprep.mubr.msk.f32.mxu1 %vm2281_vm0, %v2280_v0 }
 0x302   : > { %2000 = vmatpush3.msra.mxu1 %v1532_v40 }
 0x303   : > { %2001 = vmatprep.subr.mxu1 %v2280_v0 }
 0x304   : > { %2002 = vmatpush3.msra.mxu1 %v1531_v41 }
 0x305   : > { %807 = vadd.xlane.f32.xlu0 %v806_v62  ;;  %2003 = vmatprep.subr.mxu1 %v2280_v0 }
 0x306   : > { %2004 = vmatpush3.msra.mxu1 %v1530_v42 }
 0x307   : > { %2005 = vmatprep.subr.mxu1 %v2280_v0 }
 0x346   : > { %v881_v63 = vpop.f32.mrf.mxu1 }
 0x348   : > { %v1957_v1 = vpop.f32.mrf.mxu1 }
 0x382   : > { %v978_v2 = vpop.xlane.xlu0 %977 }
 0x386   : > { %v1153_v8 = vpop.xlane.xlu1 %1152 }
 0x38a   : > { %v1328_v3 = vpop.xlane.xlu0 %1327 }
 0x38e   : > { %v808_v4 = vpop.xlane.xlu0 %807 }
 0x38f   : > { %2124 = vrcp.f32 %v808_v4 }
 0x390   : > { %2126 = vrcp.f32 %v978_v2 }
 0x391   : > { %2128 = vrcp.f32 %v1153_v8 }
 0x392   : > { %2130 = vrcp.f32 %v1328_v3 }
 0x39c   : > { %v2125_v6 = vpop.eup %2124 }
 0x39d   : > { %v886_v7 = vmul.f32 %v2125_v6, %v881_v63  ;;  %v2127_v11 = vpop.eup %2126 }
 0x39e   : > { %v2129_v17 = vpop.eup %2128 }
 0x39f   : > { %887 = vst.msk [vmem:[#allocation4] sm:$0xff] %vm723_vm3, %v886_v7  ;;  %v2131_v21 = vpop.eup %2130 }
 0x3b8   : > { %v1051_v12 = vpop.f32.mrf.mxu1 }
 0x3b9   : > { %v1056_v14 = vmul.f32 %v2127_v11, %v1051_v12 }
 0x3ba   : > { %v1967_v15 = vpop.f32.mrf.mxu1 }
 0x3bb   : > { %1058 = vrot.lane.b32.xlu1 %v1056_v14, %s2289_s25 }
 0x3bc   : > { %v1226_v18 = vpop.f32.mrf.mxu1 }
 0x3bd   : > { %v1231_v19 = vmul.f32 %v2129_v17, %v1226_v18  ;;  %v1875_v17 = vld [vmem:[%s2786_s24] ss:$0 sm:$0xff] }
 0x3be   : > { %v1977_v20 = vpop.f32.mrf.mxu1 }
 0x3bf   : > { %1233 = vrot.lane.b32.xlu0 %v1231_v19, %s2290_s15  ;;  %s2784_s15 = sld [smem:[#allocation21_spill]]  ;;  %v1876_v19 = vld [vmem:[%s2787_s14] ss:$0 sm:$0xff] }
 0x3c0   : > { %v1401_v22 = vpop.f32.mrf.mxu1 }
 0x3c1   : > { %v1406_v23 = vmul.f32 %v2131_v21, %v1401_v22 }
 0x3c2   : > { %v1987_v24 = vpop.f32.mrf.mxu1 }
 0x3c3   : > { %1408 = vrot.lane.b32.xlu1 %v1406_v23, %s2291_s17  ;;  %s2785_s17 = sld [smem:[#allocation15_spill]] }
 0x3c5   : > { %v1873_v2 = vld [vmem:[%s2784_s15] ss:$0 sm:$0xff]  ;;  %s1735_s15 = scalar_lea.sflag [#allocation7], %s2488_s8 }
 0x3c9   : > { %s1878_s22 = sshll.u32 %s2785_s17, 7  ;;  %s2194_s17 = sshll.u32 %s2292_s27, 4  ;;  %s2195_s17 = int_to_ptr.vmem [resolvable:$false] %s2194_s17 }
 0x3ca   : > { %s1747_s25 = scalar_lea.hbm %s2788_s26, %s1878_s22  ;;  %s2196_s13 = scalar_lea.vmem %s2195_s17, 256 }
 0x3cb   : > { %p2197_p0 = scmp.lt.s32.totalorder %s1750_s12, %s2195_s17  ;;  %p2198_p2 = scmp.lt.s32.totalorder %s2196_s13, %s2190_s16 }
 0x3cd   : > { %p2199_p3 = por %p2198_p2, %p2197_p0 }
 0x3cf   : > { %p2200_p5 = pnand %p2199_p3, %p2193_p10 }
 0x42d   : > { %v1059_v25 = vpop.permute.xlu1 %1058 }
 0x42e   : > { %1062 = vst.msk [vmem:[#allocation4] sm:$0xff] %vm1061_vm4, %v1059_v25 }
 0x431   : > { %v1234_v26 = vpop.permute.xlu0 %1233 }
 0x432   : > { %1237 = vst.msk [vmem:[#allocation4] sm:$0xff] %vm1236_vm5, %v1234_v26 }
 0x435   : > { %v1409_v27 = vpop.permute.xlu1 %1408 }
 0x436   : > { %1412 = vst.msk [vmem:[#allocation4] sm:$0xff] %vm1411_vm6, %v1409_v27 }
 0x43d   : > { %v1413_v28 = vld [vmem:[#allocation4] sm:$0xff] }
 0x43e   : > { %1997 = vmatmul.mubr.msk.f32.vlgmr.msra.gmra.mxu0 %vm555_vm1, %v1413_v28 }
 0x43f   : > { %2026 = vmatprep.mubr.msk.f32.mxu0 %vm2281_vm0, %v2280_v0  ;;  %2011 = vmatpush3.msra.mxu0 %v1621_v43 }
 0x440   : > { %2012 = vmatprep.subr.mxu0 %v2280_v0 }
 0x441   : > { %2013 = vmatpush3.msra.mxu0 %v1620_v44 }
 0x442   : > { %2014 = vmatprep.subr.mxu0 %v2280_v0 }
 0x443   : > { %2015 = vmatpush3.msra.mxu0 %v1619_v45 }
 0x444   : > { %2016 = vmatprep.subr.mxu0 %v2280_v0 }
 0x445   : > { %2017 = vmatpush3.msra.mxu0 %v1618_v46 }
 0x446   : > { %2018 = vmatprep.subr.mxu0 %v2280_v0 }
 0x447   : > { %2019 = vmatpush3.msra.mxu0 %v1617_v47 }
 0x448   : > { %2020 = vmatprep.subr.mxu0 %v2280_v0 }
 0x449   : > { %2021 = vmatpush3.msra.mxu0 %v1616_v57 }
 0x44a   : > { %2022 = vmatprep.subr.mxu0 %v2280_v0 }
 0x44b   : > { %2023 = vmatpush3.msra.mxu0 %v1615_v58 }
 0x44c   : > { %2024 = vmatprep.subr.mxu0 %v2280_v0 }
 0x44d   : > { %2025 = vmatpush3.msra.mxu0 %v1614_v59 }
 0x4fe   : > { %v1494_v30 = vpop.f32.mrf.mxu0 }
 0x4ff   : > { %v1495_v31 = vadd.f32 %v1867_v29, %v1494_v30 }
 0x500   : > { %v1998_v32 = vpop.f32.mrf.mxu0 }
 0x501   : > { %v1498_v33 = vadd.f32 %v1495_v31, %v2522_v5  ;;  %v1529_v5 = vld [vmem:[#allocation8] sm:$0xff] }
 0x502   : > { %2006 = vmatpush3.msra.mxu1 %v1529_v5 }
 0x503   : > { %v1499_v34 = vsel %vm555_vm1, %v1498_v33, 0.0 }
 0x504   : > { %1500 = vadd.xlane.f32.xlu1 %v1499_v34 }
 0x58d   : > { %v1501_v35 = vpop.xlane.xlu1 %1500 }
 0x58e   : > { %v1503_v36 = vmul.f32 0.03125, %v1501_v35 }
 0x590   : > { %v1504_v37 = vsub.f32 %v1498_v33, %v1503_v36 }
 0x592   : > { %v1505_v38 = vmul.f32 %v1504_v37, %v1504_v37 }
 0x594   : > { %v1506_v39 = vsel %vm555_vm1, %v1505_v38, 0.0 }
 0x595   : > { %1507 = vadd.xlane.f32.xlu0 %v1506_v39 }
 0x61e   : > { %v1508_v48 = vpop.xlane.xlu0 %1507 }
 0x61f   : > { %v1509_v49 = vmul.f32 0.03125, %v1508_v48 }
 0x621   : > { %v1510_v50 = vadd.f32 1e-05, %v1509_v49 }
 0x623   : > { %2132 = vrsqrt.f32 %v1510_v50 }
 0x630   : > { %v2133_v51 = vpop.eup %2132 }
 0x631   : > { %v1512_v53 = vmul.f32 %v2133_v51, %v1504_v37 }
 0x633   : > { %v1520_v55 = vmul.f32 %v1869_v52, %v1512_v53 }
 0x635   : > { %v1528_v56 = vadd.f32 %v1870_v54, %v1520_v55 }
 0x637   : > { %2008 = vmatmul.mubr.msk.f32.vlgmr.msra.gmra.mxu1 %vm555_vm1, %v1528_v56 }
 0x6f7   : > { %v1609_v61 = vpop.f32.mrf.mxu1 }
 0x6f8   : > { %v1610_v62 = vadd.f32 %v1871_v60, %v1609_v61 }
 0x6f9   : > { %v2009_v63 = vpop.f32.mrf.mxu1 }
 0x6fa   : > { %v1613_v1 = vmax.f32 %v1610_v62, 0.0 }
 0x6fc   : > { %2027 = vmatmul.mubr.msk.f32.vlgmr.msra.gmra.mxu0 %vm629_vm2, %v1613_v1 }
 0x7bc   : > { %v1699_v3 = vpop.f32.mrf.mxu0 }
 0x7bd   : > { %v1700_v4 = vadd.f32 %v1873_v2, %v1699_v3 }
 0x7be   : > { %v2028_v6 = vpop.f32.mrf.mxu0 }
 0x7bf   : > { %v1703_v7 = vadd.f32 %v1700_v4, %v1528_v56 }
 0x7c1   : > { %v1704_v0 = vsel %vm555_vm1, %v1703_v7, 0.0 }
 0x7c2   : > { %1705 = vadd.xlane.f32.xlu0 %v1704_v0 }
 0x84b   : > { %v1706_v8 = vpop.xlane.xlu0 %1705 }
 0x84c   : > { %v1707_v9 = vmul.f32 0.03125, %v1706_v8 }
 0x84e   : > { %v1708_v10 = vsub.f32 %v1703_v7, %v1707_v9 }
 0x850   : > { %v1709_v11 = vmul.f32 %v1708_v10, %v1708_v10 }
 0x852   : > { %v1710_v12 = vsel %vm555_vm1, %v1709_v11, 0.0 }
 0x853   : > { %1711 = vadd.xlane.f32.xlu1 %v1710_v12 }
 0x8dc   : > { %v1712_v13 = vpop.xlane.xlu1 %1711 }
 0x8dd   : > { %v1713_v14 = vmul.f32 0.03125, %v1712_v13 }
 0x8df   : > { %v1714_v15 = vadd.f32 1e-05, %v1713_v14 }
 0x8e1   : > { %2134 = vrsqrt.f32 %v1714_v15 }
 0x8ee   : > { %v2135_v16 = vpop.eup %2134 }
 0x8ef   : > { %v1716_v18 = vmul.f32 %v2135_v16, %v1708_v10 }
 0x8f1   : > { %v1724_v20 = vmul.f32 %v1875_v17, %v1716_v18 }
 0x8f3   : > { %v1732_v21 = vadd.f32 %v1876_v19, %v1724_v20 }
 0x8f5   : > { %1733 = vst.msk [vmem:[%s538_s10] sm:$0xff] %vm555_vm1, %v1732_v21 }
 0x8f6   : > { %2203 = shalt.err (!%p2200_p5)
}
 0x8f7   : > { %s2204_s24 = scalar_lea.hbm %s1747_s25, 128  ;;  %s2208_s7 = scalar_lea.hbm %s2788_s26, 256 }
 0x8f8   : > { %p2205_p7 = scmp.ne.s32.totalorder %s1747_s25, %s2204_s24  ;;  %p2209_p9 = scmp.lt.s32.totalorder %s1747_s25, %s2788_s26 }
 0x8f9   : > { %p2210_p11 = scmp.lt.s32.totalorder %s2208_s7, %s2204_s24 }
 0x8fa   : > { %p2206_p6 = pnand %p2205_p7, %p2460_p13 }
 0x8fb   : > { %p2211_p12 = por %p2210_p11, %p2209_p9 }
 0x8fc   : > { %p2207_p4 = pneg %p2206_p6 }
 0x8fe   : > { %p2212_p1 = pnand %p2211_p12, %p2207_p4 }
 0x900   : > { %2215 = shalt.err (!%p2212_p1)
}
 0x901   : > { %2035 = dma.vmem_to_hbm [thread:$0]  (%p2460_p13), %s1750_s12, 128, %s1747_s25, %s1735_s15  }
 0x902 PF: > { %s2789_s10 = sld [smem:[#allocation14_spill]]  ;;  %p2792_p10 = scmp.ge.s32.totalorder %s2274_s23, 2 }
 0x903   : > { %s2790_s28 = sld [smem:[#allocation17_spill]] }
 0x908   : > { %s1761_s30 = sand.u32 1, %s2789_s10  }
 0x909   : > { %p2791_p8 = scmp.ne.s32.totalorder %s2790_s28, 0  ;;  %s1762_s16 = scalar_lea.sflag [#allocation7], %s1761_s30 }
 0x90b   : > { %p2046_p0 = pnand %p2792_p10, %p2791_p8 }
 0x90d   : > { %p2047_p2 = pneg %p2046_p0 }
 0x90f   : > { %2249 = dma.done.wait (%p2047_p2), %s1762_s16, 128  }
 0x910   : > { %2251 = vsyncadd (%p2047_p2), %s1762_s16, 4294967168  ;;  %s32_s23 = sadd.s32 1, %s2274_s23   ;;  %s2793_s27 = smov %s2469_s18 }
 0x911   : > { %p29_p3 = scmp.ge.s32.totalorder %s32_s23, 4   ;;  %s2794_s21 = sld [smem:[#allocation16_spill]] }
 0x912   : > { %s2795_s22 = sld [smem:[#allocation18_spill]]  ;;  %s2796_s18 = smov %s2258_s19 }
 0x913   : > { %s2797_s19 = smov %s2262_s20  ;;  %s2798_s20 = smov %s2793_s27 }
 0x914   :  { %31 = sbr.rel (!%p29_p3) target bundleno = 15 (0xf), region = 134 }
 0x919   :  { %1767 = vsyncpa [#allocation6], 1 }
 0x91a   :  { %1769 = vsyncpa [#allocation6 + $0x1], 1 }
 0x91b   :  { %1770 = vsyncpa [#allocation9], 1 }
 0x91c   :  { %1771 = vsyncpa [#allocation7], 1 }
 0x91d   :  { %1773 = vsyncpa [#allocation7 + $0x1], 1 }

// kernel: tpu_custom_call.1
= control target key start
LH: loop header
LB: loop body
LE: loop exit
PB: predicated region body
PF: predicated region fallthrough
CT: control target
= control target key end

     0   :  { %s2737_s0 = inlined_call_operand.hbm [shape: f32[2,8,32], index: 0, kind: input, shape index: {}]   ;;  %s2738_s1 = inlined_call_operand.vmem [shape: f32[32,32], index: 1, kind: input, shape index: {}]   ;;  %s2739_s2 = inlined_call_operand.vmem [shape: f32[1,32], index: 2, kind: input, shape index: {}]   ;;  %s2740_s3 = inlined_call_operand.vmem [shape: f32[32,64], index: 3, kind: input, shape index: {}]   ;;  %s2741_s4 = inlined_call_operand.vmem [shape: f32[1,64], index: 4, kind: input, shape index: {}]   ;;  %s2742_s5 = inlined_call_operand.vmem [shape: f32[32,32], index: 5, kind: input, shape index: {}]   ;;  %s2743_s6 = inlined_call_operand.vmem [shape: f32[1,32], index: 6, kind: input, shape index: {}]   ;;  %s2744_s7 = inlined_call_operand.hbm [shape: f32[32,64], index: 7, kind: input, shape index: {}]   ;;  %s2745_s8 = inlined_call_operand.vmem [shape: f32[1,64], index: 8, kind: input, shape index: {}]   ;;  %s2746_s9 = inlined_call_operand.vmem [shape: f32[64,32], index: 9, kind: input, shape index: {}]   ;;  %s2747_s10 = inlined_call_operand.vmem [shape: f32[1,32], index: 10, kind: input, shape index: {}]   ;;  %s2748_s11 = inlined_call_operand.vmem [shape: f32[1,32], index: 11, kind: input, shape index: {}]   ;;  %s2749_s12 = inlined_call_operand.vmem [shape: f32[1,32], index: 12, kind: input, shape index: {}]   ;;  %s2750_s13 = inlined_call_operand.vmem [shape: f32[1,32], index: 13, kind: input, shape index: {}]   ;;  %s2751_s14 = inlined_call_operand.vmem [shape: f32[1,32], index: 14, kind: input, shape index: {}]   ;;  %s2752_s15 = inlined_call_operand.hbm [shape: f32[2,8,32], index: 15, kind: output, shape index: {}]  }
   0x1   :  { %2759 = sst [smem:[#allocation19_spill]] %s2744_s7 }
   0x2   :  { %2760 = sst [smem:[#allocation20_spill]] %s2745_s8 }
   0x3   :  { %2761 = sst [smem:[#allocation21_spill]] %s2747_s10 }
   0x4   :  { %2762 = sst [smem:[#allocation22_spill]] %s2749_s12 }
   0x5   :  { %2763 = sst [smem:[#allocation23_spill]] %s2750_s13 }
   0x6   :  { %2764 = sst [smem:[#allocation24_spill]] %s2751_s14 }
   0x7   :  { %2765 = sst [smem:[#allocation25_spill]] %s2752_s15 }
   0x8   :  { %20 = vsyncpa [#allocation6], 0 }
   0x9   :  { %22 = vsyncpa [#allocation6 + $0x1], 0 }
   0xa   :  { %23 = vsyncpa [#allocation9], 0 }
   0xb   :  { %24 = vsyncpa [#allocation7], 0 }
   0xc   :  { %26 = vsyncpa [#allocation7 + $0x1], 0  ;;  %s2373_s18 = smov 0   ;;  %s2375_s19 = smov 0  }
   0xd   :  { %s2377_s20 = smov 0   ;;  %s2379_s21 = smov 0  }
   0xe   :  { %s2381_s22 = smov 0   ;;  %s2383_s23 = smov 0  }
   0xf LB: > { %2766 = sst [smem:[#allocation14_spill]] %s2254_s18  ;;  %s1840_s24 = sadd.s32 4294967295, %s2274_s23   ;;  %s2274_s23 = sphi %s2383_s23, %s32_s23   ;;  %s2270_s22 = sphi %s2381_s22, %s2795_s22   ;;  %s2266_s21 = sphi %s2379_s21, %s2794_s21   ;;  %s2262_s20 = sphi %s2377_s20, %s2798_s20   ;;  %s2258_s19 = sphi %s2375_s19, %s2797_s19   ;;  %s2254_s18 = sphi %s2373_s18, %s2796_s18  }
  0x10   : > { %2767 = sst [smem:[#allocation15_spill]] %s2266_s21  ;;  %s1841_s25 = sadd.s32 4294967294, %s2274_s23  }
  0x11   : > { %2768 = sst [smem:[#allocation16_spill]] %s2270_s22  ;;  %p64_p0 = scmp.ne.s32.totalorder %s2258_s19, %s2254_s18 }
  0x12   : > { %p2407_p1 = scmp.eq.s32.totalorder %s1840_s24, 0  ;;  %p2411_p2 = scmp.eq.s32.totalorder %s1840_s24, 1 }
  0x13   : > { %p390_p3 = scmp.eq.s32.totalorder %s1841_s25, 1  ;;  %p1842_p5 = scmp.ge.s32.totalorder %s2274_s23, 1 }
  0x14   : > { %p2417_p4 = por %p2407_p1, %p64_p0  ;;  %p397_p7 = scmp.lt.s32.totalorder %s2274_s23, 3 }
  0x15   : > { %p2422_p6 = por %p390_p3, %p64_p0  ;;  %s2276_s16 = smov [#allocation8]  }
  0x16   : > { %s2771_s28 = scalar_select %p2417_p4, 1, 0 }
  0x17   : > { %s2772_s29 = scalar_select %p2422_p6, 1, 0 }
  0x18   : > { %p2427_p8 = pnand %p1842_p5, %p397_p7  ;;  %s427_s17 = sshll.u32 %s2276_s16, 4  ;;  %s428_s17 = int_to_ptr.vmem [resolvable:$true] %s427_s17 }
  0x19   : > { %2773 = sst [smem:[#allocation17_spill]] %s2772_s29  ;;  %s44_s25 = sadd.s32 1, %s2270_s22 }
  0x1a   : > { %p2037_p9 = pneg %p2427_p8  ;;  %s2147_s29 = scalar_lea.vmem %s428_s17, 512 }
  0x1b   : > { %p2148_p13 = scmp.ne.s32.totalorder %s428_s17, %s2147_s29  ;;  %p2155_p5 = scmp.lt.s32.totalorder %s428_s17, %s428_s17 }
  0x1c   : > { %p2436_p11 = pnand %p2037_p9, %p2407_p1  ;;  %p2156_p7 = scmp.lt.s32.totalorder %s2147_s29, %s2147_s29 }
  0x1e   : > { %p2138_p12 = pneg %p2436_p11  ;;  %p2157_p6 = por %p2156_p7, %p2155_p5 }
  0x20   : > { %p2150_p0 = pnand %p2148_p13, %p2138_p12 }
  0x22   : > { %p2151_p3 = pneg %p2150_p0 }
  0x24   : > { %p2158_p4 = pnand %p2157_p6, %p2151_p3 }
  0x26   : > { %2161 = shalt.err (!%p2158_p4)
}
  0x27   : > { %s2277_s16 = smov 128   ;;  %s2278_s18 = smov 8  }
  0x28   : > { %s2776_s7 = sld [smem:[#allocation19_spill]]  ;;  %p46_p6 = scmp.ge.s32.totalorder %s44_s25, 2 }
  0x29   : > { %s51_s29 = sadd.s32 1, %s2262_s20  ;;  %p58_p4 = scmp.ne.s32.totalorder %s2262_s20, %s2258_s19 }
  0x2a   : > { %p59_p9 = scmp.eq.s32.totalorder %s2274_s23, 0  ;;  %s2800_s25 = smov (%p46_p6, %s44_s25), 0 }
  0x2b   : > { %2777 = sst [smem:[#allocation18_spill]] %s2800_s25  ;;  %p2460_p13 = por %p2411_p2, %p58_p4 }
  0x2c   : > { %p2454_p12 = por %p59_p9, %p58_p4  ;;  %s48_s24 = ssub.s32 %s2270_s22, %s2800_s25 }
  0x2d   : > { %p2050_p0 = scmp.lt.s32.totalorder %s2274_s23, 2  ;;  %s462_s14 = sand.u32 1, %s2262_s20  }
  0x2e   : > { %2040 = dma.hbm_to_vmem [thread:$0]  (!%p2436_p11), %s2776_s7, 512, %s428_s17, [#allocation9], %s2277_s16, %s2277_s16, %s2278_s18  }
  0x2f   : > { %p49_p11 = scmp.eq.s32.totalorder %s48_s24, 0  ;;  %s1845_s15 = sshll.u32 %s462_s14, 3 }
  0x30   : > { %s1846_s17 = sshll.u32 %s2270_s22, 7  ;;  %s466_s8 = scalar_lea.vmem [#allocation5], %s1845_s15 }
  0x31   : > { %s2469_s18 = scalar_select %p49_p11, %s2262_s20, %s51_s29  }
  0x32   : > { %s471_s10 = scalar_lea.hbm %s2737_s0, %s1846_s17  ;;  %s473_s12 = sshll.u32 %s466_s8, 4  ;;  %s474_s12 = int_to_ptr.vmem [resolvable:$true] %s473_s12 }
  0x33   : > { %p2477_p2 = pnand %p2050_p0, %p2454_p12  ;;  %s463_s25 = scalar_lea.sflag [#allocation6], %s462_s14 }
  0x34   : > { %s2175_s24 = scalar_lea.vmem %s474_s12, 128  ;;  %s2279_s29 = smov [#allocation5]  }
  0x35   : > { %p2164_p3 = pneg %p2477_p2  ;;  %p2176_p5 = scmp.ne.s32.totalorder %s474_s12, %s2175_s24 }
  0x36   : > { %s2180_s22 = sshll.u32 %s2279_s29, 4  ;;  %s2181_s22 = int_to_ptr.vmem [resolvable:$false] %s2180_s22 }
  0x37   : > { %p2178_p7 = pnand %p2176_p5, %p2164_p3  ;;  %s2182_s7 = scalar_lea.vmem %s2181_s22, 256 }
  0x38   : > { %p2183_p4 = scmp.lt.s32.totalorder %s474_s12, %s2181_s22  ;;  %p2184_p9 = scmp.lt.s32.totalorder %s2182_s7, %s2175_s24 }
  0x39   : > { %p2179_p6 = pneg %p2178_p7 }
  0x3a   : > { %p2185_p11 = por %p2184_p9, %p2183_p4 }
  0x3c   : > { %p2186_p10 = pnand %p2185_p11, %p2179_p6 }
  0x3e   : > { %2189 = shalt.err (!%p2186_p10)
}
  0x3f   : > { %2044 = dma.hbm_to_vmem [thread:$0]  (!%p2477_p2), %s471_s10, 128, %s474_s12, %s463_s25  }
  0x40   : > { %482 = sbr.rel (%p2427_p8) target bundleno = 2306 (0x902), region = 80  ;;  %s2488_s8 = sand.u32 (!%p2427_p8), 1, %s2258_s19  }
  0x41   : > { %s1848_s13 = sshll.u32 (!%p2427_p8), %s2488_s8, 3  ;;  %s485_s14 = scalar_lea.sflag (!%p2427_p8), [#allocation6], %s2488_s8 }
  0x42   : > { %s488_s22 = scalar_lea.vmem (!%p2427_p8), [#allocation5], %s1848_s13  ;;  %p2781_p12 = scmp.ne.s32.totalorder (!%p2427_p8), %s2771_s28, 0 }
  0x45   : > { %2241 = dma.done.wait (%p2781_p12), %s485_s14, 128  }
  0x46   : > { %2243 = vsyncadd (%p2781_p12), %s485_s14, 4294967168 }
  0x47   : > { %2245 = dma.done.wait (%p2407_p1), [#allocation9], 512  }
  0x48   : > { %2247 = vsyncadd (%p2407_p1), [#allocation9], 4294966784  ;;  %v2280_v0 = vmov 0.0   ;;  %vm2281_vm0 = vmmov 0   ;;  %v547_v1 = vld [vmem:[%s2740_s3 + $0x18] sm:$0xff]  ;;  %v546_v2 = vld [vmem:[%s2740_s3 + $0x10] sm:$0xff] }
  0x49   : > { %1926 = vmatprep.subr.mxu1 %v2280_v0  ;;  %1934 = vmatprep.mubr.msk.f32.mxu1 %vm2281_vm0, %v2280_v0  ;;  %v545_v3 = vld [vmem:[%s2740_s3 + $0x8] sm:$0xff]  ;;  %v544_v4 = vld [vmem:[%s2740_s3] sm:$0xff]  ;;  %vm555_vm1 = vcmask 261120   ;;  %v637_v6 = vld [vmem:[%s2738_s1 + $0x18] sm:$0xff]  ;;  %vm629_vm2 = vcmask 523264   ;;  %vm723_vm3 = vcmask 64512  }
  0x4a   : > { %1948 = vmatprep.subr.mxu0 %v2280_v0  ;;  %1950 = vmatprep.mubr.msk.f32.mxu0 %vm2281_vm0, %v2280_v0  ;;  %v2522_v5 = vld [vmem:[%s488_s22] sm:$0xff]  ;;  %v636_v7 = vld [vmem:[%s2738_s1 + $0x10] sm:$0xff]  ;;  %v635_v8 = vld [vmem:[%s2738_s1 + $0x8] sm:$0xff]  ;;  %s2282_s25 = smov 112   ;;  %s2283_s15 = smov 120   ;;  %vm1061_vm4 = vcmask 130112  }
  0x4b   : > { %1927 = vmatpush3.msra.mxu1 %v547_v1  ;;  %v634_v9 = vld [vmem:[%s2738_s1] sm:$0xff]  ;;  %s2284_s17 = smov 104   ;;  %s2285_s16 = smov 96   ;;  %vm1236_vm5 = vcmask 195712   ;;  %vm1411_vm6 = vcmask 261312  }
  0x4c   : > { %1928 = vmatprep.subr.mxu1 %v2280_v0  ;;  %v1851_v10 = vld [vmem:[%s2741_s4] ss:$0 sm:$0xff]  ;;  %s2286_s27 = smov 80   ;;  %s2287_s24 = smov 72  }
  0x4d   : > { %1929 = vmatpush3.msra.mxu1 %v546_v2  ;;  %v1853_v14 = vld [vmem:[%s2739_s2] ss:$0 sm:$0xff]  ;;  %s2288_s29 = smov 88   ;;  %s2783_s30 = sld [smem:[#allocation20_spill]] }
  0x4e   : > { %1930 = vmatprep.subr.mxu1 %v2280_v0  ;;  %s2787_s14 = sld [smem:[#allocation24_spill]]  ;;  %s538_s10 = scalar_lea.vmem [#allocation10], %s1848_s13 }
  0x4f   : > { %1931 = vmatpush3.msra.mxu1 %v545_v3  ;;  %s1749_s12 = sshll.u32 %s538_s10, 4  ;;  %s2788_s26 = sld [smem:[#allocation25_spill]]  ;;  %s1750_s12 = int_to_ptr.vmem [resolvable:$true] %s1749_s12 }
  0x50   : > { %1932 = vmatprep.subr.mxu1 %v2280_v0 }
  0x51   : > { %1933 = vmatpush3.msra.mxu1 %v544_v4 }
  0x52   : > { %1935 = vmatmul.mubr.msk.f32.vlgmr.msra.gmra.mxu1 %vm555_vm1, %v2522_v5  ;;  %1937 = vmatprep.subr.mxu1 %v2280_v0 }
  0x53   : > { %1938 = vmatpush3.msra.mxu1 %v637_v6  ;;  %1945 = vmatprep.mubr.msk.f32.mxu1 %vm2281_vm0, %v2280_v0 }
  0x54   : > { %1939 = vmatprep.subr.mxu1 %v2280_v0 }
  0x55   : > { %1940 = vmatpush3.msra.mxu1 %v636_v7 }
  0x56   : > { %1941 = vmatprep.subr.mxu1 %v2280_v0 }
  0x57   : > { %1942 = vmatpush3.msra.mxu1 %v635_v8 }
  0x58   : > { %1943 = vmatprep.subr.mxu1 %v2280_v0 }
  0x59   : > { %1944 = vmatpush3.msra.mxu1 %v634_v9  ;;  %v1417_v9 = vld [vmem:[%s2742_s5 + $0x18] sm:$0xff] }
  0x5a   : > { %1946 = vmatmul.mubr.msk.f32.vlgmr.msra.gmra.mxu1 %vm555_vm1, %v2522_v5  ;;  %1953 = vmatprep.subr.mxu1 %v2280_v0 }
  0x5b   : > { %1955 = vmatprep.mubr.msk.f32.mxu1 %vm2281_vm0, %v2280_v0 }
 0x112   : > { %v625_v11 = vpop.f32.mrf.mxu1 }
 0x113   : > { %v626_v12 = vadd.f32 %v1851_v10, %v625_v11  ;;  %v1416_v10 = vld [vmem:[%s2742_s5 + $0x10] sm:$0xff] }
 0x114   : > { %v1936_v13 = vpop.f32.mrf.mxu1 }
 0x115   : > { %630 = vst.msk [vmem:[#allocation2] sm:$0xff] %vm629_vm2, %v626_v12  ;;  %v1415_v13 = vld [vmem:[%s2742_s5 + $0x8] sm:$0xff] }
 0x11a   : > { %v715_v15 = vpop.f32.mrf.mxu1 }
 0x11b   : > { %v716_v16 = vadd.f32 %v1853_v14, %v715_v15 }
 0x11c   : > { %v1947_v17 = vpop.f32.mrf.mxu1  ;;  %v2557_v18 = vld [vmem:[#allocation2] sm:$0xff] }
 0x11d   : > { %v719_v19 = vmul.f32 0.35355338, %v716_v16  ;;  %1069 = vrot.lane.b32.xlu1 %v2557_v18, %s2282_s25  ;;  %894 = vrot.lane.b32.xlu0 %v2557_v18, %s2283_s15  ;;  %v1414_v16 = vld [vmem:[%s2742_s5] sm:$0xff] }
 0x11e   : > { %1949 = vmatpush3.xpose.msk.msra.mxu0 %vm723_vm3, %v2557_v18 }
 0x11f   : > { %720 = vst.msk [vmem:[#allocation3] sm:$0xff] %vm555_vm1, %v719_v19  ;;  %1958 = vmatprep.subr.mxu0 %v2280_v0 }
 0x126   : > { %v1063_v20 = vld [vmem:[#allocation3] sm:$0xff] }
 0x127   : > { %1066 = vrot.lane.b32.xlu1 %v1063_v20, %s2282_s25  ;;  %891 = vrot.lane.b32.xlu0 %v1063_v20, %s2283_s15  ;;  %s2289_s25 = smov 8   ;;  %s2290_s15 = smov 16  }
 0x128   : > { %1951 = vmatmul.mubr.msk.f32.vlgmr.msra.gmra.mxu0 %vm723_vm3, %v1063_v20 }
 0x129   : > { %1960 = vmatprep.mubr.msk.f32.mxu0 %vm2281_vm0, %v2280_v0 }
 0x12b   : > { %1241 = vrot.lane.b32.xlu1 %v1063_v20, %s2284_s17  ;;  %1244 = vrot.lane.b32.xlu0 %v2557_v18, %s2284_s17  ;;  %s2291_s17 = smov 24  }
 0x12f   : > { %809 = vrot.lane.b32.xlu1 %v2557_v18, %s2285_s16  ;;  %s2190_s16 = scalar_lea.vmem %s1750_s12, 128 }
 0x130   : > { %p2191_p1 = scmp.ne.s32.totalorder %s1750_s12, %s2190_s16 }
 0x132   : > { %p2192_p8 = pnand %p2191_p1, %p2460_p13 }
 0x134   : > { %p2193_p10 = pneg %p2192_p8 }
 0x18f   : > { %v895_v21 = vpop.permute.xlu0 %894  ;;  %v1070_v22 = vpop.permute.xlu1 %1069 }
 0x190   : > { %1959 = vmatpush3.xpose.msk.msra.mxu0 %vm723_vm3, %v895_v21 }
 0x191   : > { %1968 = vmatprep.subr.mxu0 %v2280_v0 }
 0x199   : > { %v1067_v23 = vpop.permute.xlu1 %1066  ;;  %v892_v24 = vpop.permute.xlu0 %891 }
 0x19a   : > { %1961 = vmatmul.mubr.msk.f32.vlgmr.msra.gmra.mxu0 %vm723_vm3, %v892_v24 }
 0x19b   : > { %1969 = vmatpush3.xpose.msk.msra.mxu0 %vm723_vm3, %v1070_v22  ;;  %1970 = vmatprep.mubr.msk.f32.mxu0 %vm2281_vm0, %v2280_v0 }
 0x19c   : > { %1978 = vmatprep.subr.mxu0 %v2280_v0 }
 0x19d   : > { %v1242_v25 = vpop.permute.xlu1 %1241  ;;  %v1245_v26 = vpop.permute.xlu0 %1244 }
 0x19e   : > { %1971 = vmatmul.mubr.msk.f32.vlgmr.msra.gmra.mxu0 %vm723_vm3, %v1067_v23 }
 0x19f   : > { %1979 = vmatpush3.xpose.msk.msra.mxu0 %vm723_vm3, %v1245_v26  ;;  %1980 = vmatprep.mubr.msk.f32.mxu0 %vm2281_vm0, %v2280_v0 }
 0x1a0   : > { %1988 = vmatprep.subr.mxu0 %v2280_v0 }
 0x1a1   : > { %v810_v27 = vpop.permute.xlu1 %809 }
 0x1a2   : > { %1954 = vmatpush3.msra.mxu1 %v810_v27  ;;  %1981 = vmatmul.mubr.msk.f32.vlgmr.msra.gmra.mxu0 %vm723_vm3, %v1242_v25 }
 0x1a3   : > { %1963 = vmatprep.subr.mxu1 %v2280_v0  ;;  %1996 = vmatprep.mubr.msk.f32.mxu0 %vm2281_vm0, %v2280_v0 }
 0x1a4   : > { %1989 = vmatpush3.msra.mxu0 %v1417_v9 }
 0x1a5   : > { %1990 = vmatprep.subr.mxu0 %v2280_v0 }
 0x1a6   : > { %1991 = vmatpush3.msra.mxu0 %v1416_v10 }
 0x1a7   : > { %1992 = vmatprep.subr.mxu0 %v2280_v0 }
 0x1a8   : > { %1993 = vmatpush3.msra.mxu0 %v1415_v13 }
 0x1a9   : > { %1994 = vmatprep.subr.mxu0 %v2280_v0 }
 0x1aa   : > { %1995 = vmatpush3.msra.mxu0 %v1414_v16 }
 0x1ab   : > { %2010 = vmatprep.subr.mxu0 %v2280_v0 }
 0x1e8   : > { %v796_v28 = vpop.f32.mrf.mxu0 }
 0x1e9   : > { %v800_v29 = vsel %vm723_vm3, %v796_v28, -inf }
 0x1ea   : > { %801 = vmax.xlane.f32.xlu0 %v800_v29  ;;  %v1952_v30 = vpop.f32.mrf.mxu0  ;;  %v1867_v29 = vld [vmem:[%s2743_s6] ss:$0 sm:$0xff] }
 0x25a   : > { %v966_v31 = vpop.f32.mrf.mxu0 }
 0x25b   : > { %v970_v32 = vsel %vm723_vm3, %v966_v31, -inf }
 0x25c   : > { %971 = vmax.xlane.f32.xlu1 %v970_v32  ;;  %v1962_v33 = vpop.f32.mrf.mxu0 }
 0x25e   : > { %v1141_v34 = vpop.f32.mrf.mxu0 }
 0x25f   : > { %v1145_v35 = vsel %vm723_vm3, %v1141_v34, -inf }
 0x260   : > { %1146 = vmax.xlane.f32.xlu0 %v1145_v35  ;;  %v1972_v36 = vpop.f32.mrf.mxu0 }
 0x262   : > { %v1316_v37 = vpop.f32.mrf.mxu0 }
 0x263   : > { %v1320_v38 = vsel %vm723_vm3, %v1316_v37, -inf }
 0x264   : > { %1321 = vmax.xlane.f32.xlu0 %v1320_v38  ;;  %v1982_v39 = vpop.f32.mrf.mxu0 }
 0x26d   : > { %1154 = vrot.lane.b32.xlu1 %v2557_v18, %s2286_s27  ;;  %s2782_s27 = sld [smem:[#allocation22_spill]] }
 0x271   : > { %1329 = vrot.lane.b32.xlu1 %v2557_v18, %s2287_s24  ;;  %s2786_s24 = sld [smem:[#allocation23_spill]] }
 0x273   : > { %v802_v40 = vpop.xlane.xlu0 %801 }
 0x274   : > { %v803_v41 = vsub.f32 %v796_v28, %v802_v40  ;;  %v1532_v40 = vld [vmem:[#allocation8 + $0x18] sm:$0xff] }
 0x276   : > { %v804_v42 = vmul.f32 1.442695, %v803_v41  ;;  %v1531_v41 = vld [vmem:[#allocation8 + $0x10] sm:$0xff] }
 0x278   : > { %2116 = vpow2.f32 %v804_v42  ;;  %v1530_v42 = vld [vmem:[#allocation8 + $0x8] sm:$0xff] }
 0x27a   : > { %979 = vrot.lane.b32.xlu0 %v2557_v18, %s2288_s29 }
 0x285   : > { %v2117_v43 = vpop.eup %2116 }
 0x286   : > { %1956 = vmatmul.mubr.msk.f32.vlgmr.msra.gmra.mxu1 %vm723_vm3, %v2117_v43  ;;  %v806_v62 = vsel %vm723_vm3, %v2117_v43, 0.0  ;;  %v1621_v43 = vld [vmem:[%s2746_s9 + $0x38] sm:$0xff] }
 0x287   : > { %1965 = vmatprep.mubr.msk.f32.mxu1 %vm2281_vm0, %v2280_v0 }
 0x2e5   : > { %v972_v44 = vpop.xlane.xlu1 %971 }
 0x2e6   : > { %v973_v45 = vsub.f32 %v966_v31, %v972_v44  ;;  %v1620_v44 = vld [vmem:[%s2746_s9 + $0x30] sm:$0xff] }
 0x2e8   : > { %v974_v46 = vmul.f32 1.442695, %v973_v45  ;;  %v1619_v45 = vld [vmem:[%s2746_s9 + $0x28] sm:$0xff] }
 0x2e9   : > { %v1147_v47 = vpop.xlane.xlu0 %1146  ;;  %v1155_v54 = vpop.permute.xlu1 %1154 }
 0x2ea   : > { %2118 = vpow2.f32 %v974_v46  ;;  %v1148_v48 = vsub.f32 %v1141_v34, %v1147_v47  ;;  %v1618_v46 = vld [vmem:[%s2746_s9 + $0x20] sm:$0xff]  ;;  %v1617_v47 = vld [vmem:[%s2746_s9 + $0x18] sm:$0xff] }
 0x2ec   : > { %v1149_v49 = vmul.f32 1.442695, %v1148_v48 }
 0x2ed   : > { %v1322_v50 = vpop.xlane.xlu0 %1321  ;;  %v1330_v58 = vpop.permute.xlu1 %1329 }
 0x2ee   : > { %2120 = vpow2.f32 %v1149_v49  ;;  %v1323_v51 = vsub.f32 %v1316_v37, %v1322_v50 }
 0x2f0   : > { %v1324_v52 = vmul.f32 1.442695, %v1323_v51 }
 0x2f1   : > { %v980_v53 = vpop.permute.xlu0 %979 }
 0x2f2   : > { %2122 = vpow2.f32 %v1324_v52  ;;  %1964 = vmatpush3.msra.mxu1 %v980_v53  ;;  %v1869_v52 = vld [vmem:[%s2748_s11] ss:$0 sm:$0xff] }
 0x2f3   : > { %1973 = vmatprep.subr.mxu1 %v2280_v0 }
 0x2f7   : > { %v2119_v55 = vpop.eup %2118 }
 0x2f8   : > { %1966 = vmatmul.mubr.msk.f32.vlgmr.msra.gmra.mxu1 %vm723_vm3, %v2119_v55  ;;  %v976_v56 = vsel %vm723_vm3, %v2119_v55, 0.0 }
 0x2f9   : > { %1974 = vmatpush3.msra.mxu1 %v1155_v54  ;;  %977 = vadd.xlane.f32.xlu0 %v976_v56  ;;  %v1870_v54 = vld [vmem:[%s2782_s27] ss:$0 sm:$0xff]  ;;  %s2292_s27 = smov [#allocation10]  }
 0x2fa   : > { %1975 = vmatprep.mubr.msk.f32.mxu1 %vm2281_vm0, %v2280_v0  ;;  %1983 = vmatprep.subr.mxu1 %v2280_v0 }
 0x2fb   : > { %v2121_v57 = vpop.eup %2120 }
 0x2fc   : > { %1976 = vmatmul.mubr.msk.f32.vlgmr.msra.gmra.mxu1 %vm723_vm3, %v2121_v57  ;;  %v1151_v59 = vsel %vm723_vm3, %v2121_v57, 0.0  ;;  %v1616_v57 = vld [vmem:[%s2746_s9 + $0x10] sm:$0xff] }
 0x2fd   : > { %1984 = vmatpush3.msra.mxu1 %v1330_v58  ;;  %1152 = vadd.xlane.f32.xlu1 %v1151_v59  ;;  %v1615_v58 = vld [vmem:[%s2746_s9 + $0x8] sm:$0xff]  ;;  %v1614_v59 = vld [vmem:[%s2746_s9] sm:$0xff] }
 0x2fe   : > { %1985 = vmatprep.mubr.msk.f32.mxu1 %vm2281_vm0, %v2280_v0  ;;  %1999 = vmatprep.subr.mxu1 %v2280_v0 }
 0x2ff   : > { %v2123_v60 = vpop.eup %2122 }
 0x300   : > { %1986 = vmatmul.mubr.msk.f32.vlgmr.msra.gmra.mxu1 %vm723_vm3, %v2123_v60  ;;  %v1326_v61 = vsel %vm723_vm3, %v2123_v60, 0.0  ;;  %v1871_v60 = vld [vmem:[%s2783_s30] ss:$0 sm:$0xff] }
 0x301   : > { %1327 = vadd.xlane.f32.xlu0 %v1326_v61  ;;  %2007 = vmatprep.mubr.msk.f32.mxu1 %vm2281_vm0, %v2280_v0 }
 0x302   : > { %2000 = vmatpush3.msra.mxu1 %v1532_v40 }
 0x303   : > { %2001 = vmatprep.subr.mxu1 %v2280_v0 }
 0x304   : > { %2002 = vmatpush3.msra.mxu1 %v1531_v41 }
 0x305   : > { %807 = vadd.xlane.f32.xlu0 %v806_v62  ;;  %2003 = vmatprep.subr.mxu1 %v2280_v0 }
 0x306   : > { %2004 = vmatpush3.msra.mxu1 %v1530_v42 }
 0x307   : > { %2005 = vmatprep.subr.mxu1 %v2280_v0 }
 0x346   : > { %v881_v63 = vpop.f32.mrf.mxu1 }
 0x348   : > { %v1957_v1 = vpop.f32.mrf.mxu1 }
 0x382   : > { %v978_v2 = vpop.xlane.xlu0 %977 }
 0x386   : > { %v1153_v8 = vpop.xlane.xlu1 %1152 }
 0x38a   : > { %v1328_v3 = vpop.xlane.xlu0 %1327 }
 0x38e   : > { %v808_v4 = vpop.xlane.xlu0 %807 }
 0x38f   : > { %2124 = vrcp.f32 %v808_v4 }
 0x390   : > { %2126 = vrcp.f32 %v978_v2 }
 0x391   : > { %2128 = vrcp.f32 %v1153_v8 }
 0x392   : > { %2130 = vrcp.f32 %v1328_v3 }
 0x39c   : > { %v2125_v6 = vpop.eup %2124 }
 0x39d   : > { %v886_v7 = vmul.f32 %v2125_v6, %v881_v63  ;;  %v2127_v11 = vpop.eup %2126 }
 0x39e   : > { %v2129_v17 = vpop.eup %2128 }
 0x39f   : > { %887 = vst.msk [vmem:[#allocation4] sm:$0xff] %vm723_vm3, %v886_v7  ;;  %v2131_v21 = vpop.eup %2130 }
 0x3b8   : > { %v1051_v12 = vpop.f32.mrf.mxu1 }
 0x3b9   : > { %v1056_v14 = vmul.f32 %v2127_v11, %v1051_v12 }
 0x3ba   : > { %v1967_v15 = vpop.f32.mrf.mxu1 }
 0x3bb   : > { %1058 = vrot.lane.b32.xlu1 %v1056_v14, %s2289_s25 }
 0x3bc   : > { %v1226_v18 = vpop.f32.mrf.mxu1 }
 0x3bd   : > { %v1231_v19 = vmul.f32 %v2129_v17, %v1226_v18  ;;  %v1875_v17 = vld [vmem:[%s2786_s24] ss:$0 sm:$0xff] }
 0x3be   : > { %v1977_v20 = vpop.f32.mrf.mxu1 }
 0x3bf   : > { %1233 = vrot.lane.b32.xlu0 %v1231_v19, %s2290_s15  ;;  %s2784_s15 = sld [smem:[#allocation21_spill]]  ;;  %v1876_v19 = vld [vmem:[%s2787_s14] ss:$0 sm:$0xff] }
 0x3c0   : > { %v1401_v22 = vpop.f32.mrf.mxu1 }
 0x3c1   : > { %v1406_v23 = vmul.f32 %v2131_v21, %v1401_v22 }
 0x3c2   : > { %v1987_v24 = vpop.f32.mrf.mxu1 }
 0x3c3   : > { %1408 = vrot.lane.b32.xlu1 %v1406_v23, %s2291_s17  ;;  %s2785_s17 = sld [smem:[#allocation15_spill]] }
 0x3c5   : > { %v1873_v2 = vld [vmem:[%s2784_s15] ss:$0 sm:$0xff]  ;;  %s1735_s15 = scalar_lea.sflag [#allocation7], %s2488_s8 }
 0x3c9   : > { %s1878_s22 = sshll.u32 %s2785_s17, 7  ;;  %s2194_s17 = sshll.u32 %s2292_s27, 4  ;;  %s2195_s17 = int_to_ptr.vmem [resolvable:$false] %s2194_s17 }
 0x3ca   : > { %s1747_s25 = scalar_lea.hbm %s2788_s26, %s1878_s22  ;;  %s2196_s13 = scalar_lea.vmem %s2195_s17, 256 }
 0x3cb   : > { %p2197_p0 = scmp.lt.s32.totalorder %s1750_s12, %s2195_s17  ;;  %p2198_p2 = scmp.lt.s32.totalorder %s2196_s13, %s2190_s16 }
 0x3cd   : > { %p2199_p3 = por %p2198_p2, %p2197_p0 }
 0x3cf   : > { %p2200_p5 = pnand %p2199_p3, %p2193_p10 }
 0x42d   : > { %v1059_v25 = vpop.permute.xlu1 %1058 }
 0x42e   : > { %1062 = vst.msk [vmem:[#allocation4] sm:$0xff] %vm1061_vm4, %v1059_v25 }
 0x431   : > { %v1234_v26 = vpop.permute.xlu0 %1233 }
 0x432   : > { %1237 = vst.msk [vmem:[#allocation4] sm:$0xff] %vm1236_vm5, %v1234_v26 }
 0x435   : > { %v1409_v27 = vpop.permute.xlu1 %1408 }
 0x436   : > { %1412 = vst.msk [vmem:[#allocation4] sm:$0xff] %vm1411_vm6, %v1409_v27 }
 0x43d   : > { %v1413_v28 = vld [vmem:[#allocation4] sm:$0xff] }
 0x43e   : > { %1997 = vmatmul.mubr.msk.f32.vlgmr.msra.gmra.mxu0 %vm555_vm1, %v1413_v28 }
 0x43f   : > { %2026 = vmatprep.mubr.msk.f32.mxu0 %vm2281_vm0, %v2280_v0  ;;  %2011 = vmatpush3.msra.mxu0 %v1621_v43 }
 0x440   : > { %2012 = vmatprep.subr.mxu0 %v2280_v0 }
 0x441   : > { %2013 = vmatpush3.msra.mxu0 %v1620_v44 }
 0x442   : > { %2014 = vmatprep.subr.mxu0 %v2280_v0 }
 0x443   : > { %2015 = vmatpush3.msra.mxu0 %v1619_v45 }
 0x444   : > { %2016 = vmatprep.subr.mxu0 %v2280_v0 }
 0x445   : > { %2017 = vmatpush3.msra.mxu0 %v1618_v46 }
 0x446   : > { %2018 = vmatprep.subr.mxu0 %v2280_v0 }
 0x447   : > { %2019 = vmatpush3.msra.mxu0 %v1617_v47 }
 0x448   : > { %2020 = vmatprep.subr.mxu0 %v2280_v0 }
 0x449   : > { %2021 = vmatpush3.msra.mxu0 %v1616_v57 }
 0x44a   : > { %2022 = vmatprep.subr.mxu0 %v2280_v0 }
 0x44b   : > { %2023 = vmatpush3.msra.mxu0 %v1615_v58 }
 0x44c   : > { %2024 = vmatprep.subr.mxu0 %v2280_v0 }
 0x44d   : > { %2025 = vmatpush3.msra.mxu0 %v1614_v59 }
 0x4fe   : > { %v1494_v30 = vpop.f32.mrf.mxu0 }
 0x4ff   : > { %v1495_v31 = vadd.f32 %v1867_v29, %v1494_v30 }
 0x500   : > { %v1998_v32 = vpop.f32.mrf.mxu0 }
 0x501   : > { %v1498_v33 = vadd.f32 %v1495_v31, %v2522_v5  ;;  %v1529_v5 = vld [vmem:[#allocation8] sm:$0xff] }
 0x502   : > { %2006 = vmatpush3.msra.mxu1 %v1529_v5 }
 0x503   : > { %v1499_v34 = vsel %vm555_vm1, %v1498_v33, 0.0 }
 0x504   : > { %1500 = vadd.xlane.f32.xlu1 %v1499_v34 }
 0x58d   : > { %v1501_v35 = vpop.xlane.xlu1 %1500 }
 0x58e   : > { %v1503_v36 = vmul.f32 0.03125, %v1501_v35 }
 0x590   : > { %v1504_v37 = vsub.f32 %v1498_v33, %v1503_v36 }
 0x592   : > { %v1505_v38 = vmul.f32 %v1504_v37, %v1504_v37 }
 0x594   : > { %v1506_v39 = vsel %vm555_vm1, %v1505_v38, 0.0 }
 0x595   : > { %1507 = vadd.xlane.f32.xlu0 %v1506_v39 }
 0x61e   : > { %v1508_v48 = vpop.xlane.xlu0 %1507 }
 0x61f   : > { %v1509_v49 = vmul.f32 0.03125, %v1508_v48 }
 0x621   : > { %v1510_v50 = vadd.f32 1e-05, %v1509_v49 }
 0x623   : > { %2132 = vrsqrt.f32 %v1510_v50 }
 0x630   : > { %v2133_v51 = vpop.eup %2132 }
 0x631   : > { %v1512_v53 = vmul.f32 %v2133_v51, %v1504_v37 }
 0x633   : > { %v1520_v55 = vmul.f32 %v1869_v52, %v1512_v53 }
 0x635   : > { %v1528_v56 = vadd.f32 %v1870_v54, %v1520_v55 }
 0x637   : > { %2008 = vmatmul.mubr.msk.f32.vlgmr.msra.gmra.mxu1 %vm555_vm1, %v1528_v56 }
 0x6f7   : > { %v1609_v61 = vpop.f32.mrf.mxu1 }
 0x6f8   : > { %v1610_v62 = vadd.f32 %v1871_v60, %v1609_v61 }
 0x6f9   : > { %v2009_v63 = vpop.f32.mrf.mxu1 }
 0x6fa   : > { %v1613_v1 = vmax.f32 %v1610_v62, 0.0 }
 0x6fc   : > { %2027 = vmatmul.mubr.msk.f32.vlgmr.msra.gmra.mxu0 %vm629_vm2, %v1613_v1 }
 0x7bc   : > { %v1699_v3 = vpop.f32.mrf.mxu0 }
 0x7bd   : > { %v1700_v4 = vadd.f32 %v1873_v2, %v1699_v3 }
 0x7be   : > { %v2028_v6 = vpop.f32.mrf.mxu0 }
 0x7bf   : > { %v1703_v7 = vadd.f32 %v1700_v4, %v1528_v56 }
 0x7c1   : > { %v1704_v0 = vsel %vm555_vm1, %v1703_v7, 0.0 }
 0x7c2   : > { %1705 = vadd.xlane.f32.xlu0 %v1704_v0 }
 0x84b   : > { %v1706_v8 = vpop.xlane.xlu0 %1705 }
 0x84c   : > { %v1707_v9 = vmul.f32 0.03125, %v1706_v8 }
 0x84e   : > { %v1708_v10 = vsub.f32 %v1703_v7, %v1707_v9 }
 0x850   : > { %v1709_v11 = vmul.f32 %v1708_v10, %v1708_v10 }
 0x852   : > { %v1710_v12 = vsel %vm555_vm1, %v1709_v11, 0.0 }
 0x853   : > { %1711 = vadd.xlane.f32.xlu1 %v1710_v12 }
 0x8dc   : > { %v1712_v13 = vpop.xlane.xlu1 %1711 }
 0x8dd   : > { %v1713_v14 = vmul.f32 0.03125, %v1712_v13 }
 0x8df   : > { %v1714_v15 = vadd.f32 1e-05, %v1713_v14 }
 0x8e1   : > { %2134 = vrsqrt.f32 %v1714_v15 }
 0x8ee   : > { %v2135_v16 = vpop.eup %2134 }
 0x8ef   : > { %v1716_v18 = vmul.f32 %v2135_v16, %v1708_v10 }
 0x8f1   : > { %v1724_v20 = vmul.f32 %v1875_v17, %v1716_v18 }
 0x8f3   : > { %v1732_v21 = vadd.f32 %v1876_v19, %v1724_v20 }
 0x8f5   : > { %1733 = vst.msk [vmem:[%s538_s10] sm:$0xff] %vm555_vm1, %v1732_v21 }
 0x8f6   : > { %2203 = shalt.err (!%p2200_p5)
}
 0x8f7   : > { %s2204_s24 = scalar_lea.hbm %s1747_s25, 128  ;;  %s2208_s7 = scalar_lea.hbm %s2788_s26, 256 }
 0x8f8   : > { %p2205_p7 = scmp.ne.s32.totalorder %s1747_s25, %s2204_s24  ;;  %p2209_p9 = scmp.lt.s32.totalorder %s1747_s25, %s2788_s26 }
 0x8f9   : > { %p2210_p11 = scmp.lt.s32.totalorder %s2208_s7, %s2204_s24 }
 0x8fa   : > { %p2206_p6 = pnand %p2205_p7, %p2460_p13 }
 0x8fb   : > { %p2211_p12 = por %p2210_p11, %p2209_p9 }
 0x8fc   : > { %p2207_p4 = pneg %p2206_p6 }
 0x8fe   : > { %p2212_p1 = pnand %p2211_p12, %p2207_p4 }
 0x900   : > { %2215 = shalt.err (!%p2212_p1)
}
 0x901   : > { %2035 = dma.vmem_to_hbm [thread:$0]  (%p2460_p13), %s1750_s12, 128, %s1747_s25, %s1735_s15  }
 0x902 PF: > { %s2789_s10 = sld [smem:[#allocation14_spill]]  ;;  %p2792_p10 = scmp.ge.s32.totalorder %s2274_s23, 2 }
 0x903   : > { %s2790_s28 = sld [smem:[#allocation17_spill]] }
 0x908   : > { %s1761_s30 = sand.u32 1, %s2789_s10  }
 0x909   : > { %p2791_p8 = scmp.ne.s32.totalorder %s2790_s28, 0  ;;  %s1762_s16 = scalar_lea.sflag [#allocation7], %s1761_s30 }
 0x90b   : > { %p2046_p0 = pnand %p2792_p10, %p2791_p8 }
 0x90d   : > { %p2047_p2 = pneg %p2046_p0 }
 0x90f   : > { %2249 = dma.done.wait (%p2047_p2), %s1762_s16, 128  }
 0x910   : > { %2251 = vsyncadd (%p2047_p2), %s1762_s16, 4294967168  ;;  %s32_s23 = sadd.s32 1, %s2274_s23   ;;  %s2793_s27 = smov %s2469_s18 }
 0x911   : > { %p29_p3 = scmp.ge.s32.totalorder %s32_s23, 4   ;;  %s2794_s21 = sld [smem:[#allocation16_spill]] }
 0x912   : > { %s2795_s22 = sld [smem:[#allocation18_spill]]  ;;  %s2796_s18 = smov %s2258_s19 }
 0x913   : > { %s2797_s19 = smov %s2262_s20  ;;  %s2798_s20 = smov %s2793_s27 }
 0x914   :  { %31 = sbr.rel (!%p29_p3) target bundleno = 15 (0xf), region = 134 }
 0x919   :  { %1767 = vsyncpa [#allocation6], 1 }
 0x91a   :  { %1769 = vsyncpa [#allocation6 + $0x1], 1 }
 0x91b   :  { %1770 = vsyncpa [#allocation9], 1 }
 0x91c   :  { %1771 = vsyncpa [#allocation7], 1 }
 0x91d   :  { %1773 = vsyncpa [#allocation7 + $0x1], 1 }

</bundles_post_ra>
